<compile_context>
chip_gen: v7x
topology: tpu7x:2x2x1
jax: 0.10.0
libtpu: 0.0.40
codegen_flags: <defaults>
</compile_context>

<pallas_src>
import functools

import jax
import jax.numpy as jnp
from jax import lax
from jax.experimental import pallas as pl
from jax.experimental.pallas import tpu as pltpu


def _round_up(v, m):
    return ((v + m - 1) // m) * m


def _choose_c_block(C, bytes_per_channel, budget_bytes=8 * 1024 * 1024):
    """Channel-block size: as large as the VMEM budget allows (multiple of 8).

    The input block is double-buffered by the pipeline, so real VMEM use is
    2x this budget; the 48 MiB vmem_limit clamp keeps v7x (64 MiB) safe.
    """
    target = max(1, budget_bytes // max(bytes_per_channel, 1))
    if C <= target:
        return C
    return max(8, (target // 8) * 8)


def spatial_attention_kernel(x_ref, w_ref, o_ref, stk_ref, *,
                             C, K, P, H, W, Hh, Ha, has_tail):
    """One (batch element, channel block) grid step.

    x_ref:   (cc, H, W)  VMEM      -- channel block of the input
    w_ref:   (2*K*K,)    SMEM f32  -- [mean_w / C, max_w] flattened over (kh,kw)
    o_ref:   (H, Wp)     VMEM      -- lane-dense output block (Wp % 128 == 0)
    stk_ref: (2*Hh, Wp)  VMEM f32  -- stacked [channel-sum ; channel-max] slabs,
                                      each with a permanently-zero border that
                                      realizes the conv's zero padding
    """
    c_idx = pl.program_id(1)
    n_c = pl.num_programs(1)
    cc = x_ref.shape[0]
    Wp = o_ref.shape[1]

    # ---- init the resident accumulator slab on the first channel block -----
    @pl.when(c_idx == 0)
    def _init():
        stk_ref[...] = jnp.zeros_like(stk_ref)                 # zero borders
        stk_ref[Hh:Hh + H, :W] = jnp.full((H, W), -jnp.inf, jnp.float32)

    # ---- reduce this channel block to (H, W) sum / max in registers --------
    def _reduce_full_block():
        if cc <= 8:
            xb = x_ref[...].astype(jnp.float32)                # (cc, H, W)
            blk_sum = jnp.sum(xb, axis=0)
            blk_max = jnp.max(xb, axis=0)
        else:
            CH = next(c for c in (8, 4, 2, 1) if cc % c == 0)
            nchunks = cc // CH

            def body(s, carry):
                bs, bm = carry
                start = pl.multiple_of(s * CH, CH)
                chunk = x_ref[pl.ds(start, CH)].astype(jnp.float32)
                return (bs + jnp.sum(chunk, axis=0),
                        jnp.maximum(bm, jnp.max(chunk, axis=0)))

            blk_sum, blk_max = lax.fori_loop(
                0, nchunks, body,
                (jnp.zeros((H, W), jnp.float32),
                 jnp.full((H, W), -jnp.inf, jnp.float32)),
                unroll=nchunks if nchunks <= 8 else 4)

        # Exactly one RMW per statistic per grid step (was O(cc) before).
        stk_ref[:H, :W] = stk_ref[:H, :W] + blk_sum
        stk_ref[Hh:Hh + H, :W] = jnp.maximum(stk_ref[Hh:Hh + H, :W], blk_max)

    if not has_tail:
        _reduce_full_block()
    else:
        block_end = (c_idx + 1) * cc
        pl.when(block_end <= C)(_reduce_full_block)

        @pl.when(block_end > C)
        def _reduce_partial_block():
            # Only the single tail block ever takes this (slow) path; it never
            # touches the out-of-bounds channels of the padded block.
            nvalid = C - c_idx * cc

            def body(i, carry):
                xi = x_ref[i].astype(jnp.float32)              # (H, W)
                stk_ref[:H, :W] = stk_ref[:H, :W] + xi
                stk_ref[Hh:Hh + H, :W] = jnp.maximum(stk_ref[Hh:Hh + H, :W], xi)
                return carry

            lax.fori_loop(0, nvalid, body, 0)

    # ---- epilogue on the last channel block: 7x7 conv + sigmoid + store ----
    @pl.when(c_idx == n_c - 1)
    def _epilogue():
        stacked = stk_ref[...]                                 # (2*Hh, Wp) f32
        H_stk = 2 * Hh

        # Direct KxK conv (2 in-ch -> 1 out-ch, zero padding) as shift-and-add.
        # One sublane roll + one lane roll per tap serves BOTH maps (they are
        # stacked with >= P zero rows between / after the halves, so every
        # wrapped-in element is exactly the conv's zero padding).
        # 4 independent accumulators break the serial add chain for the VLIW
        # scheduler.  The mean-tap weights already carry the 1/C factor.
        acc = [jnp.zeros((Ha, Wp), jnp.float32) for _ in range(4)]
        for kh in range(K):
            sh = (P - kh) % H_stk
            rh = stacked if sh == 0 else pltpu.roll(stacked, shift=sh, axis=0)
            for kw in range(K):
                sw = (P - kw) % Wp
                r = rh if sw == 0 else pltpu.roll(rh, shift=sw, axis=1)
                j = 2 * (kw & 1)
                acc[j] = acc[j] + w_ref[kh * K + kw] * r[:Ha, :]                        # mean tap
                acc[j + 1] = acc[j + 1] + w_ref[K * K + kh * K + kw] * r[Hh:Hh + Ha, :]  # max tap

        total = (acc[0] + acc[1]) + (acc[2] + acc[3])
        # Lane-dense store (Wp % 128 == 0); wrapper slices the lane padding.
        o_ref[...] = jax.nn.sigmoid(total[:H, :]).astype(o_ref.dtype)


def spatial_attention(x, weight, *, kernel_size=7, c_block=None):
    """x: (N, C, H, W), weight: (1, 2, K, K) -> (N, 1, H, W)."""
    assert kernel_size in (3, 7), "kernel size must be 3 or 7"
    K = kernel_size
    P = 3 if kernel_size == 7 else 1
    N, C, H, W = x.shape
    assert weight.shape == (1, 2, K, K)

    itemsize = jnp.dtype(x.dtype).itemsize
    Hh = _round_up(H + P, 8)            # per-half slab height (>= H + P zero rows)
    Ha = _round_up(H, 8)                # rows actually accumulated by the conv
    Wp = _round_up(W + P, 128)          # lane-dense width (>= W + P zero cols)

    cc = c_block if c_block is not None else _choose_c_block(C, H * W * itemsize)
    cc = int(min(cc, C))
    nc = pl.cdiv(C, cc)
    has_tail = (C % cc) != 0

    # Fold the 1/C of the channel mean into the mean-map tap weights.
    w_mean = (weight[0, 0].astype(jnp.float32) / jnp.float32(C)).reshape(-1)
    w_max = weight[0, 1].astype(jnp.float32).reshape(-1)
    w_flat = jnp.concatenate([w_mean, w_max])                  # (2*K*K,) SMEM scalars

    kern = functools.partial(spatial_attention_kernel, C=C, K=K, P=P, H=H, W=W,
                             Hh=Hh, Ha=Ha, has_tail=has_tail)

    # Explicit VMEM budget; clamp at 48 MiB so it also fits v7x (64 MiB VMEM).
    vmem_bytes = (2 * cc * H * W * itemsize      # double-buffered input blocks
                  + 2 * Hh * Wp * 4              # stacked sum/max scratch slab
                  + 2 * H * Wp * itemsize        # double-buffered output block
                  + 8 * Ha * Wp * 4              # epilogue accs + roll temporaries
                  + (2 << 20))                   # headroom
    vmem_limit = int(min(max(vmem_bytes, 8 << 20), 48 << 20))

    cost = pl.CostEstimate(
        flops=int(N * H * W * (2 * C + 4 * K * K)),
        transcendentals=int(N * H * W),
        bytes_accessed=int(N * C * H * W * itemsize
                           + N * H * Wp * itemsize + 2 * K * K * 4),
    )

    out = pl.pallas_call(
        kern,
        out_shape=jax.ShapeDtypeStruct((N, H, Wp), x.dtype),
        grid=(N, nc),
        in_specs=[
            # One batch element x one channel block per grid step.
            pl.BlockSpec((None, cc, H, W), lambda n, c: (n, c, 0, 0)),
            # Small conv weight lives in SMEM, read as scalars.
            pl.BlockSpec(memory_space=pltpu.MemorySpace.SMEM),
        ],
        out_specs=pl.BlockSpec((None, H, Wp), lambda n, c: (n, 0, 0)),
        scratch_shapes=[
            pltpu.VMEM((2 * Hh, Wp), jnp.float32),   # stacked [sum ; max] slab
        ],
        compiler_params=pltpu.CompilerParams(
            dimension_semantics=("parallel", "arbitrary"),
            vmem_limit_bytes=vmem_limit,
        ),
        cost_estimate=cost,
    )(x, w_flat)

    if Wp != W:
        out = out[:, :, :W]
    return out.reshape(N, 1, H, W)


def spatial_attention_reference(x, weight):
    """Pure-JAX reference matching the PyTorch forward."""
    avg = jnp.mean(x, axis=1, keepdims=True)
    mx = jnp.max(x, axis=1, keepdims=True)
    cat = jnp.concatenate([avg, mx], axis=1)                   # (N, 2, H, W)
    pad = (weight.shape[-1] - 1) // 2
    y = lax.conv_general_dilated(
        cat, weight,
        window_strides=(1, 1),
        padding=((pad, pad), (pad, pad)),
        dimension_numbers=("NCHW", "OIHW", "NCHW"),
        precision=lax.Precision.HIGHEST,
    )
    return jax.nn.sigmoid(y)


if __name__ == "__main__":
    key = jax.random.PRNGKey(0)
    kx, kw, kx2, kw2 = jax.random.split(key, 4)
    KSIZE = 7

    # Primary config: small NCHW feature map (matches the module's intent).
    N, C, H, W = 2, 4, 16, 16
    x = jax.random.normal(kx, (N, C, H, W), dtype=jnp.float32)
    weight = 0.1 * jax.random.normal(kw, (1, 2, KSIZE, KSIZE), dtype=jnp.float32)

    out = jax.block_until_ready(spatial_attention(x, weight, kernel_size=KSIZE))
    ref = spatial_attention_reference(x, weight)
    assert out.shape == (N, 1, H, W)
    assert jnp.allclose(out, ref, atol=1e-5, rtol=1e-5), "primary mismatch vs reference"

    # Stress config: non-divisor C (partial tail block, multi-step accumulation),
    # chunked in-register reduction, and W > 128 (multi-vreg lane rolls).
    Nb, Cb, Hb, Wb = 1, 44, 8, 144
    xb = jax.random.normal(kx2, (Nb, Cb, Hb, Wb), dtype=jnp.float32)
    wb = 0.1 * jax.random.normal(kw2, (1, 2, KSIZE, KSIZE), dtype=jnp.float32)
    outb = jax.block_until_ready(
        spatial_attention(xb, wb, kernel_size=KSIZE, c_block=16))
    refb = spatial_attention_reference(xb, wb)
    assert outb.shape == (Nb, 1, Hb, Wb)
    assert jnp.allclose(outb, refb, atol=1e-5, rtol=1e-5), "stress mismatch vs reference"

    print("KERNEL_OK")
</pallas_src>

<mosaic_0001>
module attributes {stable_mosaic.version = 11 : i64} {
  func.func @spatial_attention_kernel(%arg0: i32, %arg1: i32, %arg2: memref<1x4x16x16xf32, #tpu.memory_space<vmem>>, %arg3: memref<98xf32, #tpu.memory_space<smem>>, %arg4: memref<1x16x128xf32, #tpu.memory_space<vmem>>, %arg5: memref<48x128xf32, #tpu.memory_space<vmem>>) attributes {dimension_semantics = [#tpu.dimension_semantics<parallel>, #tpu.dimension_semantics<arbitrary>], iteration_bounds = array<i64: 2, 1>, scalar_prefetch = 0 : i64, scratch_operands = 1 : i64, tpu.core_type = #tpu.core_type<tc>, window_params = [{transform_indices = @transform_0, window_bounds = array<i64: 1, 4, 16, 16>}, {transform_indices = @transform_1, window_bounds = array<i64: 98>}, {transform_indices = @transform_2, window_bounds = array<i64: 1, 16, 128>}]} {
    %c0_i32 = arith.constant 0 : i32
    %0 = arith.cmpi eq, %arg1, %c0_i32 : i32
    %1 = arith.extui %0 : i1 to i32
    %c0_i32_0 = arith.constant 0 : i32
    %2 = arith.cmpi ne, %1, %c0_i32_0 : i32
    scf.if %2 {
      %cst_14 = arith.constant 0.000000e+00 : f32
      %16 = vector.broadcast %cst_14 : f32 to vector<48x128xf32>
      %c0_15 = arith.constant 0 : index
      %c0_16 = arith.constant 0 : index
      %17 = vector.load %arg5[%c0_15, %c0_16] : memref<48x128xf32, #tpu.memory_space<vmem>>, vector<48x128xf32>
      tpu.vector_store %arg5[%c0_15, %c0_16], %16 {strides = array<i32>} : memref<48x128xf32, #tpu.memory_space<vmem>>, vector<48x128xf32>,
      %cst_17 = arith.constant 0xFF800000 : f32
      %18 = vector.broadcast %cst_17 : f32 to vector<16x16xf32>
      %c24_18 = arith.constant 24 : index
      %c0_19 = arith.constant 0 : index
      %19 = vector.load %arg5[%c24_18, %c0_19] : memref<48x128xf32, #tpu.memory_space<vmem>>, vector<16x16xf32>
      tpu.vector_store %arg5[%c24_18, %c0_19], %18 {strides = array<i32>} : memref<48x128xf32, #tpu.memory_space<vmem>>, vector<16x16xf32>,
    } else {
    }
    %c0 = arith.constant 0 : index
    %c0_1 = arith.constant 0 : index
    %c0_2 = arith.constant 0 : index
    %c0_3 = arith.constant 0 : index
    %3 = vector.load %arg2[%c0, %c0_1, %c0_2, %c0_3] : memref<1x4x16x16xf32, #tpu.memory_space<vmem>>, vector<1x4x16x16xf32>
    %4 = vector.shape_cast %3 : vector<1x4x16x16xf32> to vector<4x16x16xf32>
    %cst = arith.constant dense<0.000000e+00> : vector<16x16xf32>
    %5 = vector.multi_reduction <add>, %4, %cst [0] : vector<4x16x16xf32> to vector<16x16xf32>
    %cst_4 = arith.constant dense<0xFF800000> : vector<16x16xf32>
    %6 = vector.multi_reduction <maximumf>, %4, %cst_4 [0] : vector<4x16x16xf32> to vector<16x16xf32>
    %c0_5 = arith.constant 0 : index
    %c0_6 = arith.constant 0 : index
    %7 = vector.load %arg5[%c0_5, %c0_6] : memref<48x128xf32, #tpu.memory_space<vmem>>, vector<16x16xf32>
    %8 = arith.addf %7, %5 : vector<16x16xf32>
    %c0_7 = arith.constant 0 : index
    %c0_8 = arith.constant 0 : index
    %9 = vector.load %arg5[%c0_7, %c0_8] : memref<48x128xf32, #tpu.memory_space<vmem>>, vector<16x16xf32>
    tpu.vector_store %arg5[%c0_7, %c0_8], %8 {strides = array<i32>} : memref<48x128xf32, #tpu.memory_space<vmem>>, vector<16x16xf32>,
    %c24 = arith.constant 24 : index
    %c0_9 = arith.constant 0 : index
    %10 = vector.load %arg5[%c24, %c0_9] : memref<48x128xf32, #tpu.memory_space<vmem>>, vector<16x16xf32>
    %11 = arith.maximumf %10, %6 : vector<16x16xf32>
    %c24_10 = arith.constant 24 : index
    %c0_11 = arith.constant 0 : index
    %12 = vector.load %arg5[%c24_10, %c0_11] : memref<48x128xf32, #tpu.memory_space<vmem>>, vector<16x16xf32>
    tpu.vector_store %arg5[%c24_10, %c0_11], %11 {strides = array<i32>} : memref<48x128xf32, #tpu.memory_space<vmem>>, vector<16x16xf32>,
    %c0_i32_12 = arith.constant 0 : i32
    %13 = arith.cmpi eq, %arg1, %c0_i32_12 : i32
    %14 = arith.extui %13 : i1 to i32
    %c0_i32_13 = arith.constant 0 : i32
    %15 = arith.cmpi ne, %14, %c0_i32_13 : i32
    scf.if %15 {
      %c0_14 = arith.constant 0 : index
      %c0_15 = arith.constant 0 : index
      %16 = vector.load %arg5[%c0_14, %c0_15] : memref<48x128xf32, #tpu.memory_space<vmem>>, vector<48x128xf32>
      %cst_16 = arith.constant 0.000000e+00 : f32
      %17 = vector.broadcast %cst_16 : f32 to vector<16x128xf32>
      %cst_17 = arith.constant 0.000000e+00 : f32
      %18 = vector.broadcast %cst_17 : f32 to vector<16x128xf32>
      %cst_18 = arith.constant 0.000000e+00 : f32
      %19 = vector.broadcast %cst_18 : f32 to vector<16x128xf32>
      %cst_19 = arith.constant 0.000000e+00 : f32
      %20 = vector.broadcast %cst_19 : f32 to vector<16x128xf32>
      %c3_i32 = arith.constant 3 : i32
      %21 = tpu.dynamic_rotate %16 by %c3_i32 dim 0 : vector<48x128xf32>, i32 -> vector<48x128xf32>
      %c3_i32_20 = arith.constant 3 : i32
      %22 = tpu.dynamic_rotate %21 by %c3_i32_20 dim 1 : vector<48x128xf32>, i32 -> vector<48x128xf32>
      %c0_21 = arith.constant 0 : index
      %23 = memref.load %arg3[%c0_21] : memref<98xf32, #tpu.memory_space<smem>>
      %24 = vector.extract_strided_slice %22 {offsets = [0, 0], sizes = [16, 128], strides = [1, 1]} : vector<48x128xf32> to vector<16x128xf32>
      %25 = vector.broadcast %23 : f32 to vector<16x128xf32>
      %26 = arith.mulf %25, %24 : vector<16x128xf32>
      %27 = arith.addf %17, %26 : vector<16x128xf32>
      %c49 = arith.constant 49 : index
      %28 = memref.load %arg3[%c49] : memref<98xf32, #tpu.memory_space<smem>>
      %29 = vector.extract_strided_slice %22 {offsets = [24, 0], sizes = [16, 128], strides = [1, 1]} : vector<48x128xf32> to vector<16x128xf32>
      %30 = vector.broadcast %28 : f32 to vector<16x128xf32>
      %31 = arith.mulf %30, %29 : vector<16x128xf32>
      %32 = arith.addf %18, %31 : vector<16x128xf32>
      %c2_i32 = arith.constant 2 : i32
      %33 = tpu.dynamic_rotate %21 by %c2_i32 dim 1 : vector<48x128xf32>, i32 -> vector<48x128xf32>
      %c1 = arith.constant 1 : index
      %34 = memref.load %arg3[%c1] : memref<98xf32, #tpu.memory_space<smem>>
      %35 = vector.extract_strided_slice %33 {offsets = [0, 0], sizes = [16, 128], strides = [1, 1]} : vector<48x128xf32> to vector<16x128xf32>
      %36 = vector.broadcast %34 : f32 to vector<16x128xf32>
      %37 = arith.mulf %36, %35 : vector<16x128xf32>
      %38 = arith.addf %19, %37 : vector<16x128xf32>
      %c50 = arith.constant 50 : index
      %39 = memref.load %arg3[%c50] : memref<98xf32, #tpu.memory_space<smem>>
      %40 = vector.extract_strided_slice %33 {offsets = [24, 0], sizes = [16, 128], strides = [1, 1]} : vector<48x128xf32> to vector<16x128xf32>
      %41 = vector.broadcast %39 : f32 to vector<16x128xf32>
      %42 = arith.mulf %41, %40 : vector<16x128xf32>
      %43 = arith.addf %20, %42 : vector<16x128xf32>
      %c1_i32 = arith.constant 1 : i32
      %44 = tpu.dynamic_rotate %21 by %c1_i32 dim 1 : vector<48x128xf32>, i32 -> vector<48x128xf32>
      %c2 = arith.constant 2 : index
      %45 = memref.load %arg3[%c2] : memref<98xf32, #tpu.memory_space<smem>>
      %46 = vector.extract_strided_slice %44 {offsets = [0, 0], sizes = [16, 128], strides = [1, 1]} : vector<48x128xf32> to vector<16x128xf32>
      %47 = vector.broadcast %45 : f32 to vector<16x128xf32>
      %48 = arith.mulf %47, %46 : vector<16x128xf32>
      %49 = arith.addf %27, %48 : vector<16x128xf32>
      %c51 = arith.constant 51 : index
      %50 = memref.load %arg3[%c51] : memref<98xf32, #tpu.memory_space<smem>>
      %51 = vector.extract_strided_slice %44 {offsets = [24, 0], sizes = [16, 128], strides = [1, 1]} : vector<48x128xf32> to vector<16x128xf32>
      %52 = vector.broadcast %50 : f32 to vector<16x128xf32>
      %53 = arith.mulf %52, %51 : vector<16x128xf32>
      %54 = arith.addf %32, %53 : vector<16x128xf32>
      %c3 = arith.constant 3 : index
      %55 = memref.load %arg3[%c3] : memref<98xf32, #tpu.memory_space<smem>>
      %56 = vector.extract_strided_slice %21 {offsets = [0, 0], sizes = [16, 128], strides = [1, 1]} : vector<48x128xf32> to vector<16x128xf32>
      %57 = vector.broadcast %55 : f32 to vector<16x128xf32>
      %58 = arith.mulf %57, %56 : vector<16x128xf32>
      %59 = arith.addf %38, %58 : vector<16x128xf32>
      %c52 = arith.constant 52 : index
      %60 = memref.load %arg3[%c52] : memref<98xf32, #tpu.memory_space<smem>>
      %61 = vector.extract_strided_slice %21 {offsets = [24, 0], sizes = [16, 128], strides = [1, 1]} : vector<48x128xf32> to vector<16x128xf32>
      %62 = vector.broadcast %60 : f32 to vector<16x128xf32>
      %63 = arith.mulf %62, %61 : vector<16x128xf32>
      %64 = arith.addf %43, %63 : vector<16x128xf32>
      %c127_i32 = arith.constant 127 : i32
      %65 = tpu.dynamic_rotate %21 by %c127_i32 dim 1 : vector<48x128xf32>, i32 -> vector<48x128xf32>
      %c4 = arith.constant 4 : index
      %66 = memref.load %arg3[%c4] : memref<98xf32, #tpu.memory_space<smem>>
      %67 = vector.extract_strided_slice %65 {offsets = [0, 0], sizes = [16, 128], strides = [1, 1]} : vector<48x128xf32> to vector<16x128xf32>
      %68 = vector.broadcast %66 : f32 to vector<16x128xf32>
      %69 = arith.mulf %68, %67 : vector<16x128xf32>
      %70 = arith.addf %49, %69 : vector<16x128xf32>
      %c53 = arith.constant 53 : index
      %71 = memref.load %arg3[%c53] : memref<98xf32, #tpu.memory_space<smem>>
      %72 = vector.extract_strided_slice %65 {offsets = [24, 0], sizes = [16, 128], strides = [1, 1]} : vector<48x128xf32> to vector<16x128xf32>
      %73 = vector.broadcast %71 : f32 to vector<16x128xf32>
      %74 = arith.mulf %73, %72 : vector<16x128xf32>
      %75 = arith.addf %54, %74 : vector<16x128xf32>
      %c126_i32 = arith.constant 126 : i32
      %76 = tpu.dynamic_rotate %21 by %c126_i32 dim 1 : vector<48x128xf32>, i32 -> vector<48x128xf32>
      %c5 = arith.constant 5 : index
      %77 = memref.load %arg3[%c5] : memref<98xf32, #tpu.memory_space<smem>>
      %78 = vector.extract_strided_slice %76 {offsets = [0, 0], sizes = [16, 128], strides = [1, 1]} : vector<48x128xf32> to vector<16x128xf32>
      %79 = vector.broadcast %77 : f32 to vector<16x128xf32>
      %80 = arith.mulf %79, %78 : vector<16x128xf32>
      %81 = arith.addf %59, %80 : vector<16x128xf32>
      %c54 = arith.constant 54 : index
      %82 = memref.load %arg3[%c54] : memref<98xf32, #tpu.memory_space<smem>>
      %83 = vector.extract_strided_slice %76 {offsets = [24, 0], sizes = [16, 128], strides = [1, 1]} : vector<48x128xf32> to vector<16x128xf32>
      %84 = vector.broadcast %82 : f32 to vector<16x128xf32>
      %85 = arith.mulf %84, %83 : vector<16x128xf32>
      %86 = arith.addf %64, %85 : vector<16x128xf32>
      %c125_i32 = arith.constant 125 : i32
      %87 = tpu.dynamic_rotate %21 by %c125_i32 dim 1 : vector<48x128xf32>, i32 -> vector<48x128xf32>
      %c6 = arith.constant 6 : index
      %88 = memref.load %arg3[%c6] : memref<98xf32, #tpu.memory_space<smem>>
      %89 = vector.extract_strided_slice %87 {offsets = [0, 0], sizes = [16, 128], strides = [1, 1]} : vector<48x128xf32> to vector<16x128xf32>
      %90 = vector.broadcast %88 : f32 to vector<16x128xf32>
      %91 = arith.mulf %90, %89 : vector<16x128xf32>
      %92 = arith.addf %70, %91 : vector<16x128xf32>
      %c55 = arith.constant 55 : index
      %93 = memref.load %arg3[%c55] : memref<98xf32, #tpu.memory_space<smem>>
      %94 = vector.extract_strided_slice %87 {offsets = [24, 0], sizes = [16, 128], strides = [1, 1]} : vector<48x128xf32> to vector<16x128xf32>
      %95 = vector.broadcast %93 : f32 to vector<16x128xf32>
      %96 = arith.mulf %95, %94 : vector<16x128xf32>
      %97 = arith.addf %75, %96 : vector<16x128xf32>
      %c2_i32_22 = arith.constant 2 : i32
      %98 = tpu.dynamic_rotate %16 by %c2_i32_22 dim 0 : vector<48x128xf32>, i32 -> vector<48x128xf32>
      %c3_i32_23 = arith.constant 3 : i32
      %99 = tpu.dynamic_rotate %98 by %c3_i32_23 dim 1 : vector<48x128xf32>, i32 -> vector<48x128xf32>
      %c7 = arith.constant 7 : index
      %100 = memref.load %arg3[%c7] : memref<98xf32, #tpu.memory_space<smem>>
      %101 = vector.extract_strided_slice %99 {offsets = [0, 0], sizes = [16, 128], strides = [1, 1]} : vector<48x128xf32> to vector<16x128xf32>
      %102 = vector.broadcast %100 : f32 to vector<16x128xf32>
      %103 = arith.mulf %102, %101 : vector<16x128xf32>
      %104 = arith.addf %92, %103 : vector<16x128xf32>
      %c56 = arith.constant 56 : index
      %105 = memref.load %arg3[%c56] : memref<98xf32, #tpu.memory_space<smem>>
      %106 = vector.extract_strided_slice %99 {offsets = [24, 0], sizes = [16, 128], strides = [1, 1]} : vector<48x128xf32> to vector<16x128xf32>
      %107 = vector.broadcast %105 : f32 to vector<16x128xf32>
      %108 = arith.mulf %107, %106 : vector<16x128xf32>
      %109 = arith.addf %97, %108 : vector<16x128xf32>
      %c2_i32_24 = arith.constant 2 : i32
      %110 = tpu.dynamic_rotate %98 by %c2_i32_24 dim 1 : vector<48x128xf32>, i32 -> vector<48x128xf32>
      %c8 = arith.constant 8 : index
      %111 = memref.load %arg3[%c8] : memref<98xf32, #tpu.memory_space<smem>>
      %112 = vector.extract_strided_slice %110 {offsets = [0, 0], sizes = [16, 128], strides = [1, 1]} : vector<48x128xf32> to vector<16x128xf32>
      %113 = vector.broadcast %111 : f32 to vector<16x128xf32>
      %114 = arith.mulf %113, %112 : vector<16x128xf32>
      %115 = arith.addf %81, %114 : vector<16x128xf32>
      %c57 = arith.constant 57 : index
      %116 = memref.load %arg3[%c57] : memref<98xf32, #tpu.memory_space<smem>>
      %117 = vector.extract_strided_slice %110 {offsets = [24, 0], sizes = [16, 128], strides = [1, 1]} : vector<48x128xf32> to vector<16x128xf32>
      %118 = vector.broadcast %116 : f32 to vector<16x128xf32>
      %119 = arith.mulf %118, %117 : vector<16x128xf32>
      %120 = arith.addf %86, %119 : vector<16x128xf32>
      %c1_i32_25 = arith.constant 1 : i32
      %121 = tpu.dynamic_rotate %98 by %c1_i32_25 dim 1 : vector<48x128xf32>, i32 -> vector<48x128xf32>
      %c9 = arith.constant 9 : index
      %122 = memref.load %arg3[%c9] : memref<98xf32, #tpu.memory_space<smem>>
      %123 = vector.extract_strided_slice %121 {offsets = [0, 0], sizes = [16, 128], strides = [1, 1]} : vector<48x128xf32> to vector<16x128xf32>
      %124 = vector.broadcast %122 : f32 to vector<16x128xf32>
      %125 = arith.mulf %124, %123 : vector<16x128xf32>
      %126 = arith.addf %104, %125 : vector<16x128xf32>
      %c58 = arith.constant 58 : index
      %127 = memref.load %arg3[%c58] : memref<98xf32, #tpu.memory_space<smem>>
      %128 = vector.extract_strided_slice %121 {offsets = [24, 0], sizes = [16, 128], strides = [1, 1]} : vector<48x128xf32> to vector<16x128xf32>
      %129 = vector.broadcast %127 : f32 to vector<16x128xf32>
      %130 = arith.mulf %129, %128 : vector<16x128xf32>
      %131 = arith.addf %109, %130 : vector<16x128xf32>
      %c10 = arith.constant 10 : index
      %132 = memref.load %arg3[%c10] : memref<98xf32, #tpu.memory_space<smem>>
      %133 = vector.extract_strided_slice %98 {offsets = [0, 0], sizes = [16, 128], strides = [1, 1]} : vector<48x128xf32> to vector<16x128xf32>
      %134 = vector.broadcast %132 : f32 to vector<16x128xf32>
      %135 = arith.mulf %134, %133 : vector<16x128xf32>
      %136 = arith.addf %115, %135 : vector<16x128xf32>
      %c59 = arith.constant 59 : index
      %137 = memref.load %arg3[%c59] : memref<98xf32, #tpu.memory_space<smem>>
      %138 = vector.extract_strided_slice %98 {offsets = [24, 0], sizes = [16, 128], strides = [1, 1]} : vector<48x128xf32> to vector<16x128xf32>
      %139 = vector.broadcast %137 : f32 to vector<16x128xf32>
      %140 = arith.mulf %139, %138 : vector<16x128xf32>
      %141 = arith.addf %120, %140 : vector<16x128xf32>
      %c127_i32_26 = arith.constant 127 : i32
      %142 = tpu.dynamic_rotate %98 by %c127_i32_26 dim 1 : vector<48x128xf32>, i32 -> vector<48x128xf32>
      %c11 = arith.constant 11 : index
      %143 = memref.load %arg3[%c11] : memref<98xf32, #tpu.memory_space<smem>>
      %144 = vector.extract_strided_slice %142 {offsets = [0, 0], sizes = [16, 128], strides = [1, 1]} : vector<48x128xf32> to vector<16x128xf32>
      %145 = vector.broadcast %143 : f32 to vector<16x128xf32>
      %146 = arith.mulf %145, %144 : vector<16x128xf32>
      %147 = arith.addf %126, %146 : vector<16x128xf32>
      %c60 = arith.constant 60 : index
      %148 = memref.load %arg3[%c60] : memref<98xf32, #tpu.memory_space<smem>>
      %149 = vector.extract_strided_slice %142 {offsets = [24, 0], sizes = [16, 128], strides = [1, 1]} : vector<48x128xf32> to vector<16x128xf32>
      %150 = vector.broadcast %148 : f32 to vector<16x128xf32>
      %151 = arith.mulf %150, %149 : vector<16x128xf32>
      %152 = arith.addf %131, %151 : vector<16x128xf32>
      %c126_i32_27 = arith.constant 126 : i32
      %153 = tpu.dynamic_rotate %98 by %c126_i32_27 dim 1 : vector<48x128xf32>, i32 -> vector<48x128xf32>
      %c12 = arith.constant 12 : index
      %154 = memref.load %arg3[%c12] : memref<98xf32, #tpu.memory_space<smem>>
      %155 = vector.extract_strided_slice %153 {offsets = [0, 0], sizes = [16, 128], strides = [1, 1]} : vector<48x128xf32> to vector<16x128xf32>
      %156 = vector.broadcast %154 : f32 to vector<16x128xf32>
      %157 = arith.mulf %156, %155 : vector<16x128xf32>
      %158 = arith.addf %136, %157 : vector<16x128xf32>
      %c61 = arith.constant 61 : index
      %159 = memref.load %arg3[%c61] : memref<98xf32, #tpu.memory_space<smem>>
      %160 = vector.extract_strided_slice %153 {offsets = [24, 0], sizes = [16, 128], strides = [1, 1]} : vector<48x128xf32> to vector<16x128xf32>
      %161 = vector.broadcast %159 : f32 to vector<16x128xf32>
      %162 = arith.mulf %161, %160 : vector<16x128xf32>
      %163 = arith.addf %141, %162 : vector<16x128xf32>
      %c125_i32_28 = arith.constant 125 : i32
      %164 = tpu.dynamic_rotate %98 by %c125_i32_28 dim 1 : vector<48x128xf32>, i32 -> vector<48x128xf32>
      %c13 = arith.constant 13 : index
      %165 = memref.load %arg3[%c13] : memref<98xf32, #tpu.memory_space<smem>>
      %166 = vector.extract_strided_slice %164 {offsets = [0, 0], sizes = [16, 128], strides = [1, 1]} : vector<48x128xf32> to vector<16x128xf32>
      %167 = vector.broadcast %165 : f32 to vector<16x128xf32>
      %168 = arith.mulf %167, %166 : vector<16x128xf32>
      %169 = arith.addf %147, %168 : vector<16x128xf32>
      %c62 = arith.constant 62 : index
      %170 = memref.load %arg3[%c62] : memref<98xf32, #tpu.memory_space<smem>>
      %171 = vector.extract_strided_slice %164 {offsets = [24, 0], sizes = [16, 128], strides = [1, 1]} : vector<48x128xf32> to vector<16x128xf32>
      %172 = vector.broadcast %170 : f32 to vector<16x128xf32>
      %173 = arith.mulf %172, %171 : vector<16x128xf32>
      %174 = arith.addf %152, %173 : vector<16x128xf32>
      %c1_i32_29 = arith.constant 1 : i32
      %175 = tpu.dynamic_rotate %16 by %c1_i32_29 dim 0 : vector<48x128xf32>, i32 -> vector<48x128xf32>
      %c3_i32_30 = arith.constant 3 : i32
      %176 = tpu.dynamic_rotate %175 by %c3_i32_30 dim 1 : vector<48x128xf32>, i32 -> vector<48x128xf32>
      %c14 = arith.constant 14 : index
      %177 = memref.load %arg3[%c14] : memref<98xf32, #tpu.memory_space<smem>>
      %178 = vector.extract_strided_slice %176 {offsets = [0, 0], sizes = [16, 128], strides = [1, 1]} : vector<48x128xf32> to vector<16x128xf32>
      %179 = vector.broadcast %177 : f32 to vector<16x128xf32>
      %180 = arith.mulf %179, %178 : vector<16x128xf32>
      %181 = arith.addf %169, %180 : vector<16x128xf32>
      %c63 = arith.constant 63 : index
      %182 = memref.load %arg3[%c63] : memref<98xf32, #tpu.memory_space<smem>>
      %183 = vector.extract_strided_slice %176 {offsets = [24, 0], sizes = [16, 128], strides = [1, 1]} : vector<48x128xf32> to vector<16x128xf32>
      %184 = vector.broadcast %182 : f32 to vector<16x128xf32>
      %185 = arith.mulf %184, %183 : vector<16x128xf32>
      %186 = arith.addf %174, %185 : vector<16x128xf32>
      %c2_i32_31 = arith.constant 2 : i32
      %187 = tpu.dynamic_rotate %175 by %c2_i32_31 dim 1 : vector<48x128xf32>, i32 -> vector<48x128xf32>
      %c15 = arith.constant 15 : index
      %188 = memref.load %arg3[%c15] : memref<98xf32, #tpu.memory_space<smem>>
      %189 = vector.extract_strided_slice %187 {offsets = [0, 0], sizes = [16, 128], strides = [1, 1]} : vector<48x128xf32> to vector<16x128xf32>
      %190 = vector.broadcast %188 : f32 to vector<16x128xf32>
      %191 = arith.mulf %190, %189 : vector<16x128xf32>
      %192 = arith.addf %158, %191 : vector<16x128xf32>
      %c64 = arith.constant 64 : index
      %193 = memref.load %arg3[%c64] : memref<98xf32, #tpu.memory_space<smem>>
      %194 = vector.extract_strided_slice %187 {offsets = [24, 0], sizes = [16, 128], strides = [1, 1]} : vector<48x128xf32> to vector<16x128xf32>
      %195 = vector.broadcast %193 : f32 to vector<16x128xf32>
      %196 = arith.mulf %195, %194 : vector<16x128xf32>
      %197 = arith.addf %163, %196 : vector<16x128xf32>
      %c1_i32_32 = arith.constant 1 : i32
      %198 = tpu.dynamic_rotate %175 by %c1_i32_32 dim 1 : vector<48x128xf32>, i32 -> vector<48x128xf32>
      %c16 = arith.constant 16 : index
      %199 = memref.load %arg3[%c16] : memref<98xf32, #tpu.memory_space<smem>>
      %200 = vector.extract_strided_slice %198 {offsets = [0, 0], sizes = [16, 128], strides = [1, 1]} : vector<48x128xf32> to vector<16x128xf32>
      %201 = vector.broadcast %199 : f32 to vector<16x128xf32>
      %202 = arith.mulf %201, %200 : vector<16x128xf32>
      %203 = arith.addf %181, %202 : vector<16x128xf32>
      %c65 = arith.constant 65 : index
      %204 = memref.load %arg3[%c65] : memref<98xf32, #tpu.memory_space<smem>>
      %205 = vector.extract_strided_slice %198 {offsets = [24, 0], sizes = [16, 128], strides = [1, 1]} : vector<48x128xf32> to vector<16x128xf32>
      %206 = vector.broadcast %204 : f32 to vector<16x128xf32>
      %207 = arith.mulf %206, %205 : vector<16x128xf32>
      %208 = arith.addf %186, %207 : vector<16x128xf32>
      %c17 = arith.constant 17 : index
      %209 = memref.load %arg3[%c17] : memref<98xf32, #tpu.memory_space<smem>>
      %210 = vector.extract_strided_slice %175 {offsets = [0, 0], sizes = [16, 128], strides = [1, 1]} : vector<48x128xf32> to vector<16x128xf32>
      %211 = vector.broadcast %209 : f32 to vector<16x128xf32>
      %212 = arith.mulf %211, %210 : vector<16x128xf32>
      %213 = arith.addf %192, %212 : vector<16x128xf32>
      %c66 = arith.constant 66 : index
      %214 = memref.load %arg3[%c66] : memref<98xf32, #tpu.memory_space<smem>>
      %215 = vector.extract_strided_slice %175 {offsets = [24, 0], sizes = [16, 128], strides = [1, 1]} : vector<48x128xf32> to vector<16x128xf32>
      %216 = vector.broadcast %214 : f32 to vector<16x128xf32>
      %217 = arith.mulf %216, %215 : vector<16x128xf32>
      %218 = arith.addf %197, %217 : vector<16x128xf32>
      %c127_i32_33 = arith.constant 127 : i32
      %219 = tpu.dynamic_rotate %175 by %c127_i32_33 dim 1 : vector<48x128xf32>, i32 -> vector<48x128xf32>
      %c18 = arith.constant 18 : index
      %220 = memref.load %arg3[%c18] : memref<98xf32, #tpu.memory_space<smem>>
      %221 = vector.extract_strided_slice %219 {offsets = [0, 0], sizes = [16, 128], strides = [1, 1]} : vector<48x128xf32> to vector<16x128xf32>
      %222 = vector.broadcast %220 : f32 to vector<16x128xf32>
      %223 = arith.mulf %222, %221 : vector<16x128xf32>
      %224 = arith.addf %203, %223 : vector<16x128xf32>
      %c67 = arith.constant 67 : index
      %225 = memref.load %arg3[%c67] : memref<98xf32, #tpu.memory_space<smem>>
      %226 = vector.extract_strided_slice %219 {offsets = [24, 0], sizes = [16, 128], strides = [1, 1]} : vector<48x128xf32> to vector<16x128xf32>
      %227 = vector.broadcast %225 : f32 to vector<16x128xf32>
      %228 = arith.mulf %227, %226 : vector<16x128xf32>
      %229 = arith.addf %208, %228 : vector<16x128xf32>
      %c126_i32_34 = arith.constant 126 : i32
      %230 = tpu.dynamic_rotate %175 by %c126_i32_34 dim 1 : vector<48x128xf32>, i32 -> vector<48x128xf32>
      %c19 = arith.constant 19 : index
      %231 = memref.load %arg3[%c19] : memref<98xf32, #tpu.memory_space<smem>>
      %232 = vector.extract_strided_slice %230 {offsets = [0, 0], sizes = [16, 128], strides = [1, 1]} : vector<48x128xf32> to vector<16x128xf32>
      %233 = vector.broadcast %231 : f32 to vector<16x128xf32>
      %234 = arith.mulf %233, %232 : vector<16x128xf32>
      %235 = arith.addf %213, %234 : vector<16x128xf32>
      %c68 = arith.constant 68 : index
      %236 = memref.load %arg3[%c68] : memref<98xf32, #tpu.memory_space<smem>>
      %237 = vector.extract_strided_slice %230 {offsets = [24, 0], sizes = [16, 128], strides = [1, 1]} : vector<48x128xf32> to vector<16x128xf32>
      %238 = vector.broadcast %236 : f32 to vector<16x128xf32>
      %239 = arith.mulf %238, %237 : vector<16x128xf32>
      %240 = arith.addf %218, %239 : vector<16x128xf32>
      %c125_i32_35 = arith.constant 125 : i32
      %241 = tpu.dynamic_rotate %175 by %c125_i32_35 dim 1 : vector<48x128xf32>, i32 -> vector<48x128xf32>
      %c20 = arith.constant 20 : index
      %242 = memref.load %arg3[%c20] : memref<98xf32, #tpu.memory_space<smem>>
      %243 = vector.extract_strided_slice %241 {offsets = [0, 0], sizes = [16, 128], strides = [1, 1]} : vector<48x128xf32> to vector<16x128xf32>
      %244 = vector.broadcast %242 : f32 to vector<16x128xf32>
      %245 = arith.mulf %244, %243 : vector<16x128xf32>
      %246 = arith.addf %224, %245 : vector<16x128xf32>
      %c69 = arith.constant 69 : index
      %247 = memref.load %arg3[%c69] : memref<98xf32, #tpu.memory_space<smem>>
      %248 = vector.extract_strided_slice %241 {offsets = [24, 0], sizes = [16, 128], strides = [1, 1]} : vector<48x128xf32> to vector<16x128xf32>
      %249 = vector.broadcast %247 : f32 to vector<16x128xf32>
      %250 = arith.mulf %249, %248 : vector<16x128xf32>
      %251 = arith.addf %229, %250 : vector<16x128xf32>
      %c3_i32_36 = arith.constant 3 : i32
      %252 = tpu.dynamic_rotate %16 by %c3_i32_36 dim 1 : vector<48x128xf32>, i32 -> vector<48x128xf32>
      %c21 = arith.constant 21 : index
      %253 = memref.load %arg3[%c21] : memref<98xf32, #tpu.memory_space<smem>>
      %254 = vector.extract_strided_slice %252 {offsets = [0, 0], sizes = [16, 128], strides = [1, 1]} : vector<48x128xf32> to vector<16x128xf32>
      %255 = vector.broadcast %253 : f32 to vector<16x128xf32>
      %256 = arith.mulf %255, %254 : vector<16x128xf32>
      %257 = arith.addf %246, %256 : vector<16x128xf32>
      %c70 = arith.constant 70 : index
      %258 = memref.load %arg3[%c70] : memref<98xf32, #tpu.memory_space<smem>>
      %259 = vector.extract_strided_slice %252 {offsets = [24, 0], sizes = [16, 128], strides = [1, 1]} : vector<48x128xf32> to vector<16x128xf32>
      %260 = vector.broadcast %258 : f32 to vector<16x128xf32>
      %261 = arith.mulf %260, %259 : vector<16x128xf32>
      %262 = arith.addf %251, %261 : vector<16x128xf32>
      %c2_i32_37 = arith.constant 2 : i32
      %263 = tpu.dynamic_rotate %16 by %c2_i32_37 dim 1 : vector<48x128xf32>, i32 -> vector<48x128xf32>
      %c22 = arith.constant 22 : index
      %264 = memref.load %arg3[%c22] : memref<98xf32, #tpu.memory_space<smem>>
      %265 = vector.extract_strided_slice %263 {offsets = [0, 0], sizes = [16, 128], strides = [1, 1]} : vector<48x128xf32> to vector<16x128xf32>
      %266 = vector.broadcast %264 : f32 to vector<16x128xf32>
      %267 = arith.mulf %266, %265 : vector<16x128xf32>
      %268 = arith.addf %235, %267 : vector<16x128xf32>
      %c71 = arith.constant 71 : index
      %269 = memref.load %arg3[%c71] : memref<98xf32, #tpu.memory_space<smem>>
      %270 = vector.extract_strided_slice %263 {offsets = [24, 0], sizes = [16, 128], strides = [1, 1]} : vector<48x128xf32> to vector<16x128xf32>
      %271 = vector.broadcast %269 : f32 to vector<16x128xf32>
      %272 = arith.mulf %271, %270 : vector<16x128xf32>
      %273 = arith.addf %240, %272 : vector<16x128xf32>
      %c1_i32_38 = arith.constant 1 : i32
      %274 = tpu.dynamic_rotate %16 by %c1_i32_38 dim 1 : vector<48x128xf32>, i32 -> vector<48x128xf32>
      %c23 = arith.constant 23 : index
      %275 = memref.load %arg3[%c23] : memref<98xf32, #tpu.memory_space<smem>>
      %276 = vector.extract_strided_slice %274 {offsets = [0, 0], sizes = [16, 128], strides = [1, 1]} : vector<48x128xf32> to vector<16x128xf32>
      %277 = vector.broadcast %275 : f32 to vector<16x128xf32>
      %278 = arith.mulf %277, %276 : vector<16x128xf32>
      %279 = arith.addf %257, %278 : vector<16x128xf32>
      %c72 = arith.constant 72 : index
      %280 = memref.load %arg3[%c72] : memref<98xf32, #tpu.memory_space<smem>>
      %281 = vector.extract_strided_slice %274 {offsets = [24, 0], sizes = [16, 128], strides = [1, 1]} : vector<48x128xf32> to vector<16x128xf32>
      %282 = vector.broadcast %280 : f32 to vector<16x128xf32>
      %283 = arith.mulf %282, %281 : vector<16x128xf32>
      %284 = arith.addf %262, %283 : vector<16x128xf32>
      %c24_39 = arith.constant 24 : index
      %285 = memref.load %arg3[%c24_39] : memref<98xf32, #tpu.memory_space<smem>>
      %286 = vector.extract_strided_slice %16 {offsets = [0, 0], sizes = [16, 128], strides = [1, 1]} : vector<48x128xf32> to vector<16x128xf32>
      %287 = vector.broadcast %285 : f32 to vector<16x128xf32>
      %288 = arith.mulf %287, %286 : vector<16x128xf32>
      %289 = arith.addf %268, %288 : vector<16x128xf32>
      %c73 = arith.constant 73 : index
      %290 = memref.load %arg3[%c73] : memref<98xf32, #tpu.memory_space<smem>>
      %291 = vector.extract_strided_slice %16 {offsets = [24, 0], sizes = [16, 128], strides = [1, 1]} : vector<48x128xf32> to vector<16x128xf32>
      %292 = vector.broadcast %290 : f32 to vector<16x128xf32>
      %293 = arith.mulf %292, %291 : vector<16x128xf32>
      %294 = arith.addf %273, %293 : vector<16x128xf32>
      %c127_i32_40 = arith.constant 127 : i32
      %295 = tpu.dynamic_rotate %16 by %c127_i32_40 dim 1 : vector<48x128xf32>, i32 -> vector<48x128xf32>
      %c25 = arith.constant 25 : index
      %296 = memref.load %arg3[%c25] : memref<98xf32, #tpu.memory_space<smem>>
      %297 = vector.extract_strided_slice %295 {offsets = [0, 0], sizes = [16, 128], strides = [1, 1]} : vector<48x128xf32> to vector<16x128xf32>
      %298 = vector.broadcast %296 : f32 to vector<16x128xf32>
      %299 = arith.mulf %298, %297 : vector<16x128xf32>
      %300 = arith.addf %279, %299 : vector<16x128xf32>
      %c74 = arith.constant 74 : index
      %301 = memref.load %arg3[%c74] : memref<98xf32, #tpu.memory_space<smem>>
      %302 = vector.extract_strided_slice %295 {offsets = [24, 0], sizes = [16, 128], strides = [1, 1]} : vector<48x128xf32> to vector<16x128xf32>
      %303 = vector.broadcast %301 : f32 to vector<16x128xf32>
      %304 = arith.mulf %303, %302 : vector<16x128xf32>
      %305 = arith.addf %284, %304 : vector<16x128xf32>
      %c126_i32_41 = arith.constant 126 : i32
      %306 = tpu.dynamic_rotate %16 by %c126_i32_41 dim 1 : vector<48x128xf32>, i32 -> vector<48x128xf32>
      %c26 = arith.constant 26 : index
      %307 = memref.load %arg3[%c26] : memref<98xf32, #tpu.memory_space<smem>>
      %308 = vector.extract_strided_slice %306 {offsets = [0, 0], sizes = [16, 128], strides = [1, 1]} : vector<48x128xf32> to vector<16x128xf32>
      %309 = vector.broadcast %307 : f32 to vector<16x128xf32>
      %310 = arith.mulf %309, %308 : vector<16x128xf32>
      %311 = arith.addf %289, %310 : vector<16x128xf32>
      %c75 = arith.constant 75 : index
      %312 = memref.load %arg3[%c75] : memref<98xf32, #tpu.memory_space<smem>>
      %313 = vector.extract_strided_slice %306 {offsets = [24, 0], sizes = [16, 128], strides = [1, 1]} : vector<48x128xf32> to vector<16x128xf32>
      %314 = vector.broadcast %312 : f32 to vector<16x128xf32>
      %315 = arith.mulf %314, %313 : vector<16x128xf32>
      %316 = arith.addf %294, %315 : vector<16x128xf32>
      %c125_i32_42 = arith.constant 125 : i32
      %317 = tpu.dynamic_rotate %16 by %c125_i32_42 dim 1 : vector<48x128xf32>, i32 -> vector<48x128xf32>
      %c27 = arith.constant 27 : index
      %318 = memref.load %arg3[%c27] : memref<98xf32, #tpu.memory_space<smem>>
      %319 = vector.extract_strided_slice %317 {offsets = [0, 0], sizes = [16, 128], strides = [1, 1]} : vector<48x128xf32> to vector<16x128xf32>
      %320 = vector.broadcast %318 : f32 to vector<16x128xf32>
      %321 = arith.mulf %320, %319 : vector<16x128xf32>
      %322 = arith.addf %300, %321 : vector<16x128xf32>
      %c76 = arith.constant 76 : index
      %323 = memref.load %arg3[%c76] : memref<98xf32, #tpu.memory_space<smem>>
      %324 = vector.extract_strided_slice %317 {offsets = [24, 0], sizes = [16, 128], strides = [1, 1]} : vector<48x128xf32> to vector<16x128xf32>
      %325 = vector.broadcast %323 : f32 to vector<16x128xf32>
      %326 = arith.mulf %325, %324 : vector<16x128xf32>
      %327 = arith.addf %305, %326 : vector<16x128xf32>
      %c47_i32 = arith.constant 47 : i32
      %328 = tpu.dynamic_rotate %16 by %c47_i32 dim 0 : vector<48x128xf32>, i32 -> vector<48x128xf32>
      %c3_i32_43 = arith.constant 3 : i32
      %329 = tpu.dynamic_rotate %328 by %c3_i32_43 dim 1 : vector<48x128xf32>, i32 -> vector<48x128xf32>
      %c28 = arith.constant 28 : index
      %330 = memref.load %arg3[%c28] : memref<98xf32, #tpu.memory_space<smem>>
      %331 = vector.extract_strided_slice %329 {offsets = [0, 0], sizes = [16, 128], strides = [1, 1]} : vector<48x128xf32> to vector<16x128xf32>
      %332 = vector.broadcast %330 : f32 to vector<16x128xf32>
      %333 = arith.mulf %332, %331 : vector<16x128xf32>
      %334 = arith.addf %322, %333 : vector<16x128xf32>
      %c77 = arith.constant 77 : index
      %335 = memref.load %arg3[%c77] : memref<98xf32, #tpu.memory_space<smem>>
      %336 = vector.extract_strided_slice %329 {offsets = [24, 0], sizes = [16, 128], strides = [1, 1]} : vector<48x128xf32> to vector<16x128xf32>
      %337 = vector.broadcast %335 : f32 to vector<16x128xf32>
      %338 = arith.mulf %337, %336 : vector<16x128xf32>
      %339 = arith.addf %327, %338 : vector<16x128xf32>
      %c2_i32_44 = arith.constant 2 : i32
      %340 = tpu.dynamic_rotate %328 by %c2_i32_44 dim 1 : vector<48x128xf32>, i32 -> vector<48x128xf32>
      %c29 = arith.constant 29 : index
      %341 = memref.load %arg3[%c29] : memref<98xf32, #tpu.memory_space<smem>>
      %342 = vector.extract_strided_slice %340 {offsets = [0, 0], sizes = [16, 128], strides = [1, 1]} : vector<48x128xf32> to vector<16x128xf32>
      %343 = vector.broadcast %341 : f32 to vector<16x128xf32>
      %344 = arith.mulf %343, %342 : vector<16x128xf32>
      %345 = arith.addf %311, %344 : vector<16x128xf32>
      %c78 = arith.constant 78 : index
      %346 = memref.load %arg3[%c78] : memref<98xf32, #tpu.memory_space<smem>>
      %347 = vector.extract_strided_slice %340 {offsets = [24, 0], sizes = [16, 128], strides = [1, 1]} : vector<48x128xf32> to vector<16x128xf32>
      %348 = vector.broadcast %346 : f32 to vector<16x128xf32>
      %349 = arith.mulf %348, %347 : vector<16x128xf32>
      %350 = arith.addf %316, %349 : vector<16x128xf32>
      %c1_i32_45 = arith.constant 1 : i32
      %351 = tpu.dynamic_rotate %328 by %c1_i32_45 dim 1 : vector<48x128xf32>, i32 -> vector<48x128xf32>
      %c30 = arith.constant 30 : index
      %352 = memref.load %arg3[%c30] : memref<98xf32, #tpu.memory_space<smem>>
      %353 = vector.extract_strided_slice %351 {offsets = [0, 0], sizes = [16, 128], strides = [1, 1]} : vector<48x128xf32> to vector<16x128xf32>
      %354 = vector.broadcast %352 : f32 to vector<16x128xf32>
      %355 = arith.mulf %354, %353 : vector<16x128xf32>
      %356 = arith.addf %334, %355 : vector<16x128xf32>
      %c79 = arith.constant 79 : index
      %357 = memref.load %arg3[%c79] : memref<98xf32, #tpu.memory_space<smem>>
      %358 = vector.extract_strided_slice %351 {offsets = [24, 0], sizes = [16, 128], strides = [1, 1]} : vector<48x128xf32> to vector<16x128xf32>
      %359 = vector.broadcast %357 : f32 to vector<16x128xf32>
      %360 = arith.mulf %359, %358 : vector<16x128xf32>
      %361 = arith.addf %339, %360 : vector<16x128xf32>
      %c31 = arith.constant 31 : index
      %362 = memref.load %arg3[%c31] : memref<98xf32, #tpu.memory_space<smem>>
      %363 = vector.extract_strided_slice %328 {offsets = [0, 0], sizes = [16, 128], strides = [1, 1]} : vector<48x128xf32> to vector<16x128xf32>
      %364 = vector.broadcast %362 : f32 to vector<16x128xf32>
      %365 = arith.mulf %364, %363 : vector<16x128xf32>
      %366 = arith.addf %345, %365 : vector<16x128xf32>
      %c80 = arith.constant 80 : index
      %367 = memref.load %arg3[%c80] : memref<98xf32, #tpu.memory_space<smem>>
      %368 = vector.extract_strided_slice %328 {offsets = [24, 0], sizes = [16, 128], strides = [1, 1]} : vector<48x128xf32> to vector<16x128xf32>
      %369 = vector.broadcast %367 : f32 to vector<16x128xf32>
      %370 = arith.mulf %369, %368 : vector<16x128xf32>
      %371 = arith.addf %350, %370 : vector<16x128xf32>
      %c127_i32_46 = arith.constant 127 : i32
      %372 = tpu.dynamic_rotate %328 by %c127_i32_46 dim 1 : vector<48x128xf32>, i32 -> vector<48x128xf32>
      %c32 = arith.constant 32 : index
      %373 = memref.load %arg3[%c32] : memref<98xf32, #tpu.memory_space<smem>>
      %374 = vector.extract_strided_slice %372 {offsets = [0, 0], sizes = [16, 128], strides = [1, 1]} : vector<48x128xf32> to vector<16x128xf32>
      %375 = vector.broadcast %373 : f32 to vector<16x128xf32>
      %376 = arith.mulf %375, %374 : vector<16x128xf32>
      %377 = arith.addf %356, %376 : vector<16x128xf32>
      %c81 = arith.constant 81 : index
      %378 = memref.load %arg3[%c81] : memref<98xf32, #tpu.memory_space<smem>>
      %379 = vector.extract_strided_slice %372 {offsets = [24, 0], sizes = [16, 128], strides = [1, 1]} : vector<48x128xf32> to vector<16x128xf32>
      %380 = vector.broadcast %378 : f32 to vector<16x128xf32>
      %381 = arith.mulf %380, %379 : vector<16x128xf32>
      %382 = arith.addf %361, %381 : vector<16x128xf32>
      %c126_i32_47 = arith.constant 126 : i32
      %383 = tpu.dynamic_rotate %328 by %c126_i32_47 dim 1 : vector<48x128xf32>, i32 -> vector<48x128xf32>
      %c33 = arith.constant 33 : index
      %384 = memref.load %arg3[%c33] : memref<98xf32, #tpu.memory_space<smem>>
      %385 = vector.extract_strided_slice %383 {offsets = [0, 0], sizes = [16, 128], strides = [1, 1]} : vector<48x128xf32> to vector<16x128xf32>
      %386 = vector.broadcast %384 : f32 to vector<16x128xf32>
      %387 = arith.mulf %386, %385 : vector<16x128xf32>
      %388 = arith.addf %366, %387 : vector<16x128xf32>
      %c82 = arith.constant 82 : index
      %389 = memref.load %arg3[%c82] : memref<98xf32, #tpu.memory_space<smem>>
      %390 = vector.extract_strided_slice %383 {offsets = [24, 0], sizes = [16, 128], strides = [1, 1]} : vector<48x128xf32> to vector<16x128xf32>
      %391 = vector.broadcast %389 : f32 to vector<16x128xf32>
      %392 = arith.mulf %391, %390 : vector<16x128xf32>
      %393 = arith.addf %371, %392 : vector<16x128xf32>
      %c125_i32_48 = arith.constant 125 : i32
      %394 = tpu.dynamic_rotate %328 by %c125_i32_48 dim 1 : vector<48x128xf32>, i32 -> vector<48x128xf32>
      %c34 = arith.constant 34 : index
      %395 = memref.load %arg3[%c34] : memref<98xf32, #tpu.memory_space<smem>>
      %396 = vector.extract_strided_slice %394 {offsets = [0, 0], sizes = [16, 128], strides = [1, 1]} : vector<48x128xf32> to vector<16x128xf32>
      %397 = vector.broadcast %395 : f32 to vector<16x128xf32>
      %398 = arith.mulf %397, %396 : vector<16x128xf32>
      %399 = arith.addf %377, %398 : vector<16x128xf32>
      %c83 = arith.constant 83 : index
      %400 = memref.load %arg3[%c83] : memref<98xf32, #tpu.memory_space<smem>>
      %401 = vector.extract_strided_slice %394 {offsets = [24, 0], sizes = [16, 128], strides = [1, 1]} : vector<48x128xf32> to vector<16x128xf32>
      %402 = vector.broadcast %400 : f32 to vector<16x128xf32>
      %403 = arith.mulf %402, %401 : vector<16x128xf32>
      %404 = arith.addf %382, %403 : vector<16x128xf32>
      %c46_i32 = arith.constant 46 : i32
      %405 = tpu.dynamic_rotate %16 by %c46_i32 dim 0 : vector<48x128xf32>, i32 -> vector<48x128xf32>
      %c3_i32_49 = arith.constant 3 : i32
      %406 = tpu.dynamic_rotate %405 by %c3_i32_49 dim 1 : vector<48x128xf32>, i32 -> vector<48x128xf32>
      %c35 = arith.constant 35 : index
      %407 = memref.load %arg3[%c35] : memref<98xf32, #tpu.memory_space<smem>>
      %408 = vector.extract_strided_slice %406 {offsets = [0, 0], sizes = [16, 128], strides = [1, 1]} : vector<48x128xf32> to vector<16x128xf32>
      %409 = vector.broadcast %407 : f32 to vector<16x128xf32>
      %410 = arith.mulf %409, %408 : vector<16x128xf32>
      %411 = arith.addf %399, %410 : vector<16x128xf32>
      %c84 = arith.constant 84 : index
      %412 = memref.load %arg3[%c84] : memref<98xf32, #tpu.memory_space<smem>>
      %413 = vector.extract_strided_slice %406 {offsets = [24, 0], sizes = [16, 128], strides = [1, 1]} : vector<48x128xf32> to vector<16x128xf32>
      %414 = vector.broadcast %412 : f32 to vector<16x128xf32>
      %415 = arith.mulf %414, %413 : vector<16x128xf32>
      %416 = arith.addf %404, %415 : vector<16x128xf32>
      %c2_i32_50 = arith.constant 2 : i32
      %417 = tpu.dynamic_rotate %405 by %c2_i32_50 dim 1 : vector<48x128xf32>, i32 -> vector<48x128xf32>
      %c36 = arith.constant 36 : index
      %418 = memref.load %arg3[%c36] : memref<98xf32, #tpu.memory_space<smem>>
      %419 = vector.extract_strided_slice %417 {offsets = [0, 0], sizes = [16, 128], strides = [1, 1]} : vector<48x128xf32> to vector<16x128xf32>
      %420 = vector.broadcast %418 : f32 to vector<16x128xf32>
      %421 = arith.mulf %420, %419 : vector<16x128xf32>
      %422 = arith.addf %388, %421 : vector<16x128xf32>
      %c85 = arith.constant 85 : index
      %423 = memref.load %arg3[%c85] : memref<98xf32, #tpu.memory_space<smem>>
      %424 = vector.extract_strided_slice %417 {offsets = [24, 0], sizes = [16, 128], strides = [1, 1]} : vector<48x128xf32> to vector<16x128xf32>
      %425 = vector.broadcast %423 : f32 to vector<16x128xf32>
      %426 = arith.mulf %425, %424 : vector<16x128xf32>
      %427 = arith.addf %393, %426 : vector<16x128xf32>
      %c1_i32_51 = arith.constant 1 : i32
      %428 = tpu.dynamic_rotate %405 by %c1_i32_51 dim 1 : vector<48x128xf32>, i32 -> vector<48x128xf32>
      %c37 = arith.constant 37 : index
      %429 = memref.load %arg3[%c37] : memref<98xf32, #tpu.memory_space<smem>>
      %430 = vector.extract_strided_slice %428 {offsets = [0, 0], sizes = [16, 128], strides = [1, 1]} : vector<48x128xf32> to vector<16x128xf32>
      %431 = vector.broadcast %429 : f32 to vector<16x128xf32>
      %432 = arith.mulf %431, %430 : vector<16x128xf32>
      %433 = arith.addf %411, %432 : vector<16x128xf32>
      %c86 = arith.constant 86 : index
      %434 = memref.load %arg3[%c86] : memref<98xf32, #tpu.memory_space<smem>>
      %435 = vector.extract_strided_slice %428 {offsets = [24, 0], sizes = [16, 128], strides = [1, 1]} : vector<48x128xf32> to vector<16x128xf32>
      %436 = vector.broadcast %434 : f32 to vector<16x128xf32>
      %437 = arith.mulf %436, %435 : vector<16x128xf32>
      %438 = arith.addf %416, %437 : vector<16x128xf32>
      %c38 = arith.constant 38 : index
      %439 = memref.load %arg3[%c38] : memref<98xf32, #tpu.memory_space<smem>>
      %440 = vector.extract_strided_slice %405 {offsets = [0, 0], sizes = [16, 128], strides = [1, 1]} : vector<48x128xf32> to vector<16x128xf32>
      %441 = vector.broadcast %439 : f32 to vector<16x128xf32>
      %442 = arith.mulf %441, %440 : vector<16x128xf32>
      %443 = arith.addf %422, %442 : vector<16x128xf32>
      %c87 = arith.constant 87 : index
      %444 = memref.load %arg3[%c87] : memref<98xf32, #tpu.memory_space<smem>>
      %445 = vector.extract_strided_slice %405 {offsets = [24, 0], sizes = [16, 128], strides = [1, 1]} : vector<48x128xf32> to vector<16x128xf32>
      %446 = vector.broadcast %444 : f32 to vector<16x128xf32>
      %447 = arith.mulf %446, %445 : vector<16x128xf32>
      %448 = arith.addf %427, %447 : vector<16x128xf32>
      %c127_i32_52 = arith.constant 127 : i32
      %449 = tpu.dynamic_rotate %405 by %c127_i32_52 dim 1 : vector<48x128xf32>, i32 -> vector<48x128xf32>
      %c39 = arith.constant 39 : index
      %450 = memref.load %arg3[%c39] : memref<98xf32, #tpu.memory_space<smem>>
      %451 = vector.extract_strided_slice %449 {offsets = [0, 0], sizes = [16, 128], strides = [1, 1]} : vector<48x128xf32> to vector<16x128xf32>
      %452 = vector.broadcast %450 : f32 to vector<16x128xf32>
      %453 = arith.mulf %452, %451 : vector<16x128xf32>
      %454 = arith.addf %433, %453 : vector<16x128xf32>
      %c88 = arith.constant 88 : index
      %455 = memref.load %arg3[%c88] : memref<98xf32, #tpu.memory_space<smem>>
      %456 = vector.extract_strided_slice %449 {offsets = [24, 0], sizes = [16, 128], strides = [1, 1]} : vector<48x128xf32> to vector<16x128xf32>
      %457 = vector.broadcast %455 : f32 to vector<16x128xf32>
      %458 = arith.mulf %457, %456 : vector<16x128xf32>
      %459 = arith.addf %438, %458 : vector<16x128xf32>
      %c126_i32_53 = arith.constant 126 : i32
      %460 = tpu.dynamic_rotate %405 by %c126_i32_53 dim 1 : vector<48x128xf32>, i32 -> vector<48x128xf32>
      %c40 = arith.constant 40 : index
      %461 = memref.load %arg3[%c40] : memref<98xf32, #tpu.memory_space<smem>>
      %462 = vector.extract_strided_slice %460 {offsets = [0, 0], sizes = [16, 128], strides = [1, 1]} : vector<48x128xf32> to vector<16x128xf32>
      %463 = vector.broadcast %461 : f32 to vector<16x128xf32>
      %464 = arith.mulf %463, %462 : vector<16x128xf32>
      %465 = arith.addf %443, %464 : vector<16x128xf32>
      %c89 = arith.constant 89 : index
      %466 = memref.load %arg3[%c89] : memref<98xf32, #tpu.memory_space<smem>>
      %467 = vector.extract_strided_slice %460 {offsets = [24, 0], sizes = [16, 128], strides = [1, 1]} : vector<48x128xf32> to vector<16x128xf32>
      %468 = vector.broadcast %466 : f32 to vector<16x128xf32>
      %469 = arith.mulf %468, %467 : vector<16x128xf32>
      %470 = arith.addf %448, %469 : vector<16x128xf32>
      %c125_i32_54 = arith.constant 125 : i32
      %471 = tpu.dynamic_rotate %405 by %c125_i32_54 dim 1 : vector<48x128xf32>, i32 -> vector<48x128xf32>
      %c41 = arith.constant 41 : index
      %472 = memref.load %arg3[%c41] : memref<98xf32, #tpu.memory_space<smem>>
      %473 = vector.extract_strided_slice %471 {offsets = [0, 0], sizes = [16, 128], strides = [1, 1]} : vector<48x128xf32> to vector<16x128xf32>
      %474 = vector.broadcast %472 : f32 to vector<16x128xf32>
      %475 = arith.mulf %474, %473 : vector<16x128xf32>
      %476 = arith.addf %454, %475 : vector<16x128xf32>
      %c90 = arith.constant 90 : index
      %477 = memref.load %arg3[%c90] : memref<98xf32, #tpu.memory_space<smem>>
      %478 = vector.extract_strided_slice %471 {offsets = [24, 0], sizes = [16, 128], strides = [1, 1]} : vector<48x128xf32> to vector<16x128xf32>
      %479 = vector.broadcast %477 : f32 to vector<16x128xf32>
      %480 = arith.mulf %479, %478 : vector<16x128xf32>
      %481 = arith.addf %459, %480 : vector<16x128xf32>
      %c45_i32 = arith.constant 45 : i32
      %482 = tpu.dynamic_rotate %16 by %c45_i32 dim 0 : vector<48x128xf32>, i32 -> vector<48x128xf32>
      %c3_i32_55 = arith.constant 3 : i32
      %483 = tpu.dynamic_rotate %482 by %c3_i32_55 dim 1 : vector<48x128xf32>, i32 -> vector<48x128xf32>
      %c42 = arith.constant 42 : index
      %484 = memref.load %arg3[%c42] : memref<98xf32, #tpu.memory_space<smem>>
      %485 = vector.extract_strided_slice %483 {offsets = [0, 0], sizes = [16, 128], strides = [1, 1]} : vector<48x128xf32> to vector<16x128xf32>
      %486 = vector.broadcast %484 : f32 to vector<16x128xf32>
      %487 = arith.mulf %486, %485 : vector<16x128xf32>
      %488 = arith.addf %476, %487 : vector<16x128xf32>
      %c91 = arith.constant 91 : index
      %489 = memref.load %arg3[%c91] : memref<98xf32, #tpu.memory_space<smem>>
      %490 = vector.extract_strided_slice %483 {offsets = [24, 0], sizes = [16, 128], strides = [1, 1]} : vector<48x128xf32> to vector<16x128xf32>
      %491 = vector.broadcast %489 : f32 to vector<16x128xf32>
      %492 = arith.mulf %491, %490 : vector<16x128xf32>
      %493 = arith.addf %481, %492 : vector<16x128xf32>
      %c2_i32_56 = arith.constant 2 : i32
      %494 = tpu.dynamic_rotate %482 by %c2_i32_56 dim 1 : vector<48x128xf32>, i32 -> vector<48x128xf32>
      %c43 = arith.constant 43 : index
      %495 = memref.load %arg3[%c43] : memref<98xf32, #tpu.memory_space<smem>>
      %496 = vector.extract_strided_slice %494 {offsets = [0, 0], sizes = [16, 128], strides = [1, 1]} : vector<48x128xf32> to vector<16x128xf32>
      %497 = vector.broadcast %495 : f32 to vector<16x128xf32>
      %498 = arith.mulf %497, %496 : vector<16x128xf32>
      %499 = arith.addf %465, %498 : vector<16x128xf32>
      %c92 = arith.constant 92 : index
      %500 = memref.load %arg3[%c92] : memref<98xf32, #tpu.memory_space<smem>>
      %501 = vector.extract_strided_slice %494 {offsets = [24, 0], sizes = [16, 128], strides = [1, 1]} : vector<48x128xf32> to vector<16x128xf32>
      %502 = vector.broadcast %500 : f32 to vector<16x128xf32>
      %503 = arith.mulf %502, %501 : vector<16x128xf32>
      %504 = arith.addf %470, %503 : vector<16x128xf32>
      %c1_i32_57 = arith.constant 1 : i32
      %505 = tpu.dynamic_rotate %482 by %c1_i32_57 dim 1 : vector<48x128xf32>, i32 -> vector<48x128xf32>
      %c44 = arith.constant 44 : index
      %506 = memref.load %arg3[%c44] : memref<98xf32, #tpu.memory_space<smem>>
      %507 = vector.extract_strided_slice %505 {offsets = [0, 0], sizes = [16, 128], strides = [1, 1]} : vector<48x128xf32> to vector<16x128xf32>
      %508 = vector.broadcast %506 : f32 to vector<16x128xf32>
      %509 = arith.mulf %508, %507 : vector<16x128xf32>
      %510 = arith.addf %488, %509 : vector<16x128xf32>
      %c93 = arith.constant 93 : index
      %511 = memref.load %arg3[%c93] : memref<98xf32, #tpu.memory_space<smem>>
      %512 = vector.extract_strided_slice %505 {offsets = [24, 0], sizes = [16, 128], strides = [1, 1]} : vector<48x128xf32> to vector<16x128xf32>
      %513 = vector.broadcast %511 : f32 to vector<16x128xf32>
      %514 = arith.mulf %513, %512 : vector<16x128xf32>
      %515 = arith.addf %493, %514 : vector<16x128xf32>
      %c45 = arith.constant 45 : index
      %516 = memref.load %arg3[%c45] : memref<98xf32, #tpu.memory_space<smem>>
      %517 = vector.extract_strided_slice %482 {offsets = [0, 0], sizes = [16, 128], strides = [1, 1]} : vector<48x128xf32> to vector<16x128xf32>
      %518 = vector.broadcast %516 : f32 to vector<16x128xf32>
      %519 = arith.mulf %518, %517 : vector<16x128xf32>
      %520 = arith.addf %499, %519 : vector<16x128xf32>
      %c94 = arith.constant 94 : index
      %521 = memref.load %arg3[%c94] : memref<98xf32, #tpu.memory_space<smem>>
      %522 = vector.extract_strided_slice %482 {offsets = [24, 0], sizes = [16, 128], strides = [1, 1]} : vector<48x128xf32> to vector<16x128xf32>
      %523 = vector.broadcast %521 : f32 to vector<16x128xf32>
      %524 = arith.mulf %523, %522 : vector<16x128xf32>
      %525 = arith.addf %504, %524 : vector<16x128xf32>
      %c127_i32_58 = arith.constant 127 : i32
      %526 = tpu.dynamic_rotate %482 by %c127_i32_58 dim 1 : vector<48x128xf32>, i32 -> vector<48x128xf32>
      %c46 = arith.constant 46 : index
      %527 = memref.load %arg3[%c46] : memref<98xf32, #tpu.memory_space<smem>>
      %528 = vector.extract_strided_slice %526 {offsets = [0, 0], sizes = [16, 128], strides = [1, 1]} : vector<48x128xf32> to vector<16x128xf32>
      %529 = vector.broadcast %527 : f32 to vector<16x128xf32>
      %530 = arith.mulf %529, %528 : vector<16x128xf32>
      %531 = arith.addf %510, %530 : vector<16x128xf32>
      %c95 = arith.constant 95 : index
      %532 = memref.load %arg3[%c95] : memref<98xf32, #tpu.memory_space<smem>>
      %533 = vector.extract_strided_slice %526 {offsets = [24, 0], sizes = [16, 128], strides = [1, 1]} : vector<48x128xf32> to vector<16x128xf32>
      %534 = vector.broadcast %532 : f32 to vector<16x128xf32>
      %535 = arith.mulf %534, %533 : vector<16x128xf32>
      %536 = arith.addf %515, %535 : vector<16x128xf32>
      %c126_i32_59 = arith.constant 126 : i32
      %537 = tpu.dynamic_rotate %482 by %c126_i32_59 dim 1 : vector<48x128xf32>, i32 -> vector<48x128xf32>
      %c47 = arith.constant 47 : index
      %538 = memref.load %arg3[%c47] : memref<98xf32, #tpu.memory_space<smem>>
      %539 = vector.extract_strided_slice %537 {offsets = [0, 0], sizes = [16, 128], strides = [1, 1]} : vector<48x128xf32> to vector<16x128xf32>
      %540 = vector.broadcast %538 : f32 to vector<16x128xf32>
      %541 = arith.mulf %540, %539 : vector<16x128xf32>
      %542 = arith.addf %520, %541 : vector<16x128xf32>
      %c96 = arith.constant 96 : index
      %543 = memref.load %arg3[%c96] : memref<98xf32, #tpu.memory_space<smem>>
      %544 = vector.extract_strided_slice %537 {offsets = [24, 0], sizes = [16, 128], strides = [1, 1]} : vector<48x128xf32> to vector<16x128xf32>
      %545 = vector.broadcast %543 : f32 to vector<16x128xf32>
      %546 = arith.mulf %545, %544 : vector<16x128xf32>
      %547 = arith.addf %525, %546 : vector<16x128xf32>
      %c125_i32_60 = arith.constant 125 : i32
      %548 = tpu.dynamic_rotate %482 by %c125_i32_60 dim 1 : vector<48x128xf32>, i32 -> vector<48x128xf32>
      %c48 = arith.constant 48 : index
      %549 = memref.load %arg3[%c48] : memref<98xf32, #tpu.memory_space<smem>>
      %550 = vector.extract_strided_slice %548 {offsets = [0, 0], sizes = [16, 128], strides = [1, 1]} : vector<48x128xf32> to vector<16x128xf32>
      %551 = vector.broadcast %549 : f32 to vector<16x128xf32>
      %552 = arith.mulf %551, %550 : vector<16x128xf32>
      %553 = arith.addf %531, %552 : vector<16x128xf32>
      %c97 = arith.constant 97 : index
      %554 = memref.load %arg3[%c97] : memref<98xf32, #tpu.memory_space<smem>>
      %555 = vector.extract_strided_slice %548 {offsets = [24, 0], sizes = [16, 128], strides = [1, 1]} : vector<48x128xf32> to vector<16x128xf32>
      %556 = vector.broadcast %554 : f32 to vector<16x128xf32>
      %557 = arith.mulf %556, %555 : vector<16x128xf32>
      %558 = arith.addf %536, %557 : vector<16x128xf32>
      %559 = arith.addf %553, %558 : vector<16x128xf32>
      %560 = arith.addf %542, %547 : vector<16x128xf32>
      %561 = arith.addf %559, %560 : vector<16x128xf32>
      %562 = arith.negf %561 : vector<16x128xf32>
      %563 = math.exp %562 : vector<16x128xf32>
      %cst_61 = arith.constant 1.000000e+00 : f32
      %564 = vector.broadcast %cst_61 : f32 to vector<16x128xf32>
      %565 = arith.addf %564, %563 : vector<16x128xf32>
      %566 = arith.divf %564, %565 : vector<16x128xf32>
      %c0_62 = arith.constant 0 : index
      %c0_63 = arith.constant 0 : index
      %c0_64 = arith.constant 0 : index
      %567 = vector.load %arg4[%c0_62, %c0_63, %c0_64] : memref<1x16x128xf32, #tpu.memory_space<vmem>>, vector<1x16x128xf32>
      %568 = vector.shape_cast %567 : vector<1x16x128xf32> to vector<16x128xf32>
      %569 = vector.shape_cast %566 : vector<16x128xf32> to vector<1x16x128xf32>
      tpu.vector_store %arg4[%c0_62, %c0_63, %c0_64], %569 {strides = array<i32>} : memref<1x16x128xf32, #tpu.memory_space<vmem>>, vector<1x16x128xf32>,
    } else {
    }
    return
  }
  func.func @transform_0(%arg0: i32, %arg1: i32) -> (i32, i32, i32, i32) {
    %c0_i32 = arith.constant 0 : i32
    %c0_i32_0 = arith.constant 0 : i32
    %c0_i32_1 = arith.constant 0 : i32
    return %arg0, %arg1, %c0_i32, %c0_i32_0 : i32, i32, i32, i32
  }
  func.func @transform_1(%arg0: i32, %arg1: i32) -> i32 {
    %c0_i32 = arith.constant 0 : i32
    %c0_i32_0 = arith.constant 0 : i32
    return %c0_i32 : i32
  }
  func.func @transform_2(%arg0: i32, %arg1: i32) -> (i32, i32, i32) {
    %c0_i32 = arith.constant 0 : i32
    %c0_i32_0 = arith.constant 0 : i32
    %c0_i32_1 = arith.constant 0 : i32
    return %arg0, %c0_i32, %c0_i32_0 : i32, i32, i32
  }
}

</mosaic_0001>

<bundles_post_ra>
// kernel: tpu_custom_call.1
= control target key start
LH: loop header
LB: loop body
LE: loop exit
PB: predicated region body
PF: predicated region fallthrough
CT: control target
= control target key end

     0   :  { %s3051_s0 = inlined_call_operand.hbm [shape: f32[2,4,16,16], index: 0, kind: input, shape index: {}]   ;;  %s3052_s1 = inlined_call_operand.vmem [shape: f32[98], index: 1, kind: input, shape index: {}]   ;;  %s3053_s2 = inlined_call_operand.hbm [shape: f32[2,16,128], index: 2, kind: output, shape index: {}]  }
   0x1   :  { %3077 = sst [smem:[#allocation27_spill]] %s3051_s0 }
   0x2   :  { %3078 = sst [smem:[#allocation28_spill]] %s3052_s1 }
   0x3   :  { %7 = vsyncpa [#allocation4], 0 }
   0x4   :  { %9 = vsyncpa [#allocation4 + $0x1], 0 }
   0x5   :  { %10 = vsyncpa [#allocation6], 0 }
   0x6   :  { %11 = vsyncpa [#allocation5], 0 }
   0x7   :  { %13 = vsyncpa [#allocation5 + $0x1], 0  ;;  %s1766_s9 = smov 0   ;;  %s1768_s10 = smov 0  }
   0x8   :  { %s1770_s11 = smov 0   ;;  %s1772_s12 = smov 0  }
   0x9   :  { %s1774_s13 = smov 0   ;;  %s1776_s14 = smov 0  }
   0xa LB: > { %3079 = sst [smem:[#allocation12_spill]] %s1730_s13  ;;  %s1387_s15 = sadd.s32 4294967295, %s1734_s14   ;;  %s1734_s14 = sphi %s1776_s14, %s19_s14   ;;  %s1730_s13 = sphi %s1774_s13, %s3145_s13   ;;  %s1726_s12 = sphi %s1772_s12, %s3144_s12   ;;  %s1722_s11 = sphi %s1770_s11, %s3148_s11   ;;  %s1718_s10 = sphi %s1768_s10, %s3147_s10   ;;  %s1714_s9 = sphi %s1766_s9, %s3146_s9  }
   0xb   : > { %s1388_s16 = sadd.s32 4294967294, %s1734_s14   ;;  %s40_s17 = sadd.s32 1, %s1722_s11 }
   0xc   : > { %p47_p0 = scmp.ne.s32.totalorder %s1722_s11, %s1718_s10  ;;  %p48_p1 = scmp.eq.s32.totalorder %s1734_s14, 0 }
   0xd   : > { %p53_p2 = scmp.ne.s32.totalorder %s1718_s10, %s1714_s9  ;;  %p1804_p3 = scmp.eq.s32.totalorder %s1387_s15, 0 }
   0xe   : > { %p98_p4 = scmp.eq.s32.totalorder %s1387_s15, 1  ;;  %p1808_p5 = por %p48_p1, %p47_p0 }
   0xf   : > { %s3080_s18 = scalar_select %p1804_p3, 1, 0 }
  0x10   : > { %p104_p6 = scmp.eq.s32.totalorder %s1388_s16, 1  ;;  %p1814_p7 = por %p1804_p3, %p53_p2 }
  0x11   : > { %p1818_p8 = por %p98_p4, %p47_p0  ;;  %p1389_p10 = scmp.ge.s32.totalorder %s1734_s14, 1 }
  0x12   : > { %s3082_s20 = scalar_select %p1814_p7, 1, 0 }
  0x13   : > { %s3083_s21 = scalar_select %p1818_p8, 1, 0 }
  0x14   : > { %p1822_p9 = por %p104_p6, %p53_p2  ;;  %p111_p11 = scmp.lt.s32.totalorder %s1734_s14, 3 }
  0x15   : > { %s3085_s1 = sld [smem:[#allocation28_spill]]  ;;  %p1526_p0 = scmp.lt.s32.totalorder %s1734_s14, 2 }
  0x16   : > { %s3084_s22 = scalar_select %p1822_p9, 1, 0 }
  0x17   : > { %p1831_p12 = pnand %p1389_p10, %p111_p11  ;;  %p1841_p2 = pnand %p1526_p0, %p1808_p5 }
  0x18   : > { %s31_s29 = sadd.s32 1, %s1730_s13  ;;  %s135_s3 = sand.u32 1, %s1722_s11  }
  0x19   : > { %p1513_p1 = pneg %p1831_p12  ;;  %p1852_p6 = scmp.ge.s32.totalorder %s31_s29, 2 }
  0x1b   : > { %s124_s25 = sshll.u32 %s3085_s1, 4  ;;  %p1847_p4 = pnand %p1513_p1, %p1804_p3  ;;  %s125_s25 = int_to_ptr.vmem [resolvable:$true] %s124_s25 }
  0x1c   : > { %s1603_s4 = scalar_lea.vmem %s125_s25, 16  ;;  %p1611_p13 = scmp.lt.s32.totalorder %s125_s25, %s125_s25 }
  0x1d   : > { %p1604_p10 = scmp.ne.s32.totalorder %s125_s25, %s1603_s4  ;;  %p1605_p11 = pneg %p1847_p4 }
  0x1e   : > { %p1612_p9 = scmp.lt.s32.totalorder %s1603_s4, %s1603_s4 }
  0x1f   : > { %p1606_p5 = pnand %p1605_p11, %p1604_p10 }
  0x20   : > { %p1613_p8 = por %p1612_p9, %p1611_p13 }
  0x21   : > { %p1607_p0 = pneg %p1606_p5 }
  0x23   : > { %p1614_p1 = pnand %p1613_p8, %p1607_p0 }
  0x25   : > { %1617 = shalt.err (!%p1614_p1)
}
  0x26   : > { %s1736_s5 = smov [#allocation7]   ;;  %s3150_s29 = smov (%p1852_p6, %s31_s29), 0 }
  0x27   : > { %1516 = dma.vmem_to_smem (!%p1847_p4), %s125_s25, 16, %s1736_s5, [#allocation6]  }
  0x28   : > { %3090 = sst [smem:[#allocation13_spill]] %s3150_s29  ;;  %s1392_s6 = sshll.u32 %s135_s3, 6 }
  0x29   : > { %s35_s7 = ssub.s32 %s1730_s13, %s3150_s29  ;;  %s1503_s8 = sshll.u32 %s1730_s13, 10 }
  0x2a   : > { %p38_p9 = scmp.eq.s32.totalorder %s35_s7, 0  ;;  %s3091_s0 = sld [smem:[#allocation27_spill]] }
  0x2b   : > { %s139_s23 = scalar_lea.vmem [#allocation3], %s1392_s6  ;;  %s1880_s28 = scalar_lea.sflag [#allocation4], %s135_s3 }
  0x2c   : > { %s149_s24 = sshll.u32 %s139_s23, 4  ;;  %p1620_p13 = pneg %p1841_p2  ;;  %s1878_s24 = int_to_ptr.vmem [resolvable:$true] %s149_s24 }
  0x2d   : > { %s1876_s25 = scalar_select %p38_p9, %s1722_s11, %s40_s17  }
  0x2f   : > { %3092 = sst [smem:[#allocation14_spill]] %s1876_s25 }
  0x30   : > { %s1871_s19 = scalar_lea.hbm %s3091_s0, %s1503_s8  ;;  %s1623_s6 = scalar_lea.hbm %s3091_s0, 2048 }
  0x31   : > { %s1618_s30 = scalar_lea.hbm %s1871_s19, 1024  ;;  %p1624_p10 = scmp.lt.u32.totalorder %s1871_s19, %s3091_s0 }
  0x32   : > { %p1619_p8 = scmp.ne.s32.totalorder %s1871_s19, %s1618_s30  ;;  %p1625_p11 = scmp.lt.u32.totalorder %s1623_s6, %s1618_s30 }
  0x33   : > { %p1627_p0 = scmp.lt.u32.totalorder %s1618_s30, %s1871_s19 }
  0x34   : > { %p1621_p4 = pnand %p1620_p13, %p1619_p8  ;;  %p1626_p5 = por %p1625_p11, %p1624_p10 }
  0x36   : > { %p1622_p6 = pneg %p1621_p4  ;;  %p1628_p1 = por %p1627_p0, %p1626_p5 }
  0x38   : > { %p1629_p9 = pnand %p1628_p1, %p1622_p6 }
  0x3a   : > { %1632 = shalt.err (!%p1629_p9)
}
  0x3b   : > { %s1633_s17 = scalar_lea.vmem %s1878_s24, 1024  ;;  %s1737_s3 = smov [#allocation3]  }
  0x3c   : > { %p1634_p8 = scmp.ne.s32.totalorder %s1878_s24, %s1633_s17  ;;  %s1638_s15 = sshll.u32 %s1737_s3, 4  ;;  %s1639_s15 = int_to_ptr.vmem [resolvable:$false] %s1638_s15 }
  0x3d   : > { %s1640_s16 = scalar_lea.vmem %s1639_s15, 2048  ;;  %p1641_p7 = scmp.lt.s32.totalorder %s1878_s24, %s1639_s15 }
  0x3e   : > { %p1636_p4 = pnand %p1634_p8, %p1620_p13  ;;  %p1642_p10 = scmp.lt.s32.totalorder %s1640_s16, %s1633_s17 }
  0x40   : > { %p1637_p3 = pneg %p1636_p4  ;;  %p1643_p11 = por %p1642_p10, %p1641_p7 }
  0x42   : > { %p1644_p5 = pnand %p1643_p11, %p1637_p3 }
  0x44   : > { %1647 = shalt.err (!%p1644_p5)
}
  0x45   : > { %s1738_s23 = smov 128   ;;  %s1739_s30 = smov 8  }
  0x46   : > { %1520 = dma.hbm_to_vmem [thread:$0]  (!%p1841_p2), %s1871_s19, 1024, %s1878_s24, %s1880_s28, %s1738_s23, %s1738_s23, %s1739_s30  }
  0x47   : > { %161 = sbr.rel (%p1831_p12) target bundleno = 604 (0x25c), region = 28 }
  0x4e   : > { %s1911_s4 = sand.u32 1, %s1718_s10   ;;  %p3093_p3 = scmp.ne.s32.totalorder %s3082_s20, 0 }
  0x4f   : > { %s1396_s5 = sshll.u32 %s1911_s4, 6  ;;  %s164_s6 = scalar_lea.sflag [#allocation4], %s1911_s4 }
  0x50   : > { %s167_s7 = scalar_lea.vmem [#allocation3], %s1396_s5 }
  0x51   : > { %1701 = dma.done.wait (%p3093_p3), %s164_s6, 1024  }
  0x52   : > { %1703 = vsyncadd (%p3093_p3), %s164_s6, 4294966272  ;;  %p3094_p7 = scmp.ne.s32.totalorder %s3080_s18, 0 }
  0x54   : > { %1705 = dma.done.wait (%p3094_p7), [#allocation6], 16  }
  0x55   : > { %1707 = vsyncadd (%p3094_p7), [#allocation6], 4294967280 }
  0x56   : > { %176 = sfence }
  0x57   : > { %vm204_vm0 = vcmask 130048   ;;  %v207_v0 = vld [vmem:[%s167_s7] sm:$0xff]  ;;  %v208_v1 = vld [vmem:[%s167_s7 + $0x8] sm:$0xff]  ;;  %v209_v2 = vld [vmem:[%s167_s7 + $0x10] sm:$0xff]  ;;  %v3058_v3 = vmov 0.0   ;;  %v1741_v10 = vmov -inf   ;;  %v271_v40 = vlaneseq }
  0x58   : > { %198 = vst [vmem:[#allocation2] sm:$0xff] %v3058_v3  ;;  %199 = vst [vmem:[#allocation2 + $0x8] sm:$0xff] %v3058_v3  ;;  %v210_v4 = vld [vmem:[%s167_s7 + $0x18] sm:$0xff]  ;;  %v211_v5 = vld [vmem:[%s167_s7 + $0x20] sm:$0xff]  ;;  %v216_v7 = vsel %vm204_vm0, %v207_v0, 0.0  ;;  %v217_v8 = vsel %vm204_vm0, %v209_v2, 0.0 }
  0x59   : > { %201 = vst [vmem:[#allocation2 + $0x18] sm:$0xff] %v3058_v3  ;;  %202 = vst [vmem:[#allocation2 + $0x20] sm:$0xff] %v3058_v3  ;;  %v212_v6 = vld [vmem:[%s167_s7 + $0x28] sm:$0xff]  ;;  %v223_v9 = vsel %vm204_vm0, %v208_v1, 0.0  ;;  %v213_v11 = vld [vmem:[%s167_s7 + $0x30] sm:$0xff]  ;;  %v218_v13 = vadd.f32 %v217_v8, %v216_v7  ;;  %v219_v14 = vsel %vm204_vm0, %v211_v5, 0.0 }
  0x5a   : > { %203 = vst [vmem:[#allocation2 + $0x28] sm:$0xff] %v3058_v3  ;;  %205 = vst.msk [vmem:[#allocation2 + $0x18] sm:$0xff] %vm204_vm0, %v1741_v10  ;;  %v214_v12 = vld [vmem:[%s167_s7 + $0x38] sm:$0xff]  ;;  %v224_v15 = vsel %vm204_vm0, %v210_v4, 0.0  ;;  %v226_v16 = vsel %vm204_vm0, %v212_v6, 0.0  ;;  %v221_v17 = vsel %vm204_vm0, %v213_v11, 0.0 }
  0x5b   : > { %206 = vst.msk [vmem:[#allocation2 + $0x20] sm:$0xff] %vm204_vm0, %v1741_v10  ;;  %v225_v18 = vadd.f32 %v224_v15, %v223_v9  ;;  %v228_v19 = vsel %vm204_vm0, %v214_v12, 0.0  ;;  %v230_v20 = vsel %vm204_vm0, %v207_v0, -inf  ;;  %v220_v21 = vadd.f32 %v219_v14, %v218_v13  ;;  %s3067_s18 = smov 3   ;;  %s3061_s20 = smov 2  }
  0x5c   : > { %v231_v22 = vsel %vm204_vm0, %v209_v2, -inf  ;;  %v232_v23 = vsel %vm204_vm0, %v211_v5, -inf  ;;  %v234_v24 = vsel %vm204_vm0, %v213_v11, -inf  ;;  %v237_v28 = vsel %vm204_vm0, %v208_v1, -inf  ;;  %s3063_s26 = smov 1   ;;  %s3059_s27 = smov 127  }
  0x5d   : > { %v227_v25 = vadd.f32 %v226_v16, %v225_v18  ;;  %v233_v26 = vmax.f32 %v230_v20, %v232_v23  ;;  %v235_v27 = vmax.f32 %v231_v22, %v234_v24  ;;  %v222_v29 = vadd.f32 %v221_v17, %v220_v21  ;;  %s3065_s19 = smov 126   ;;  %s3069_s24 = smov 125  }
  0x5e   : > { %v238_v30 = vsel %vm204_vm0, %v210_v4, -inf  ;;  %v239_v31 = vsel %vm204_vm0, %v212_v6, -inf  ;;  %v241_v32 = vsel %vm204_vm0, %v214_v12, -inf  ;;  %v1950_v43 = vshrl.u32 %v271_v40, 7  ;;  %s1400_s28 = sld [smem:[#allocation7 + $0x1]]  ;;  %s1404_s8 = sld [smem:[#allocation7 + $0x3]] }
  0x5f   : > { %v229_v33 = vadd.f32 %v228_v19, %v227_v25  ;;  %v236_v34 = vmax.f32 %v233_v26, %v235_v27  ;;  %v240_v35 = vmax.f32 %v237_v28, %v239_v31  ;;  %v242_v36 = vmax.f32 %v238_v30, %v241_v32  ;;  %248 = vst.msk [vmem:[#allocation2] sm:$0xff] %vm204_vm0, %v222_v29  ;;  %s2200_s17 = sld [smem:[#allocation7 + $0x5]]  ;;  %s2206_s3 = sld [smem:[#allocation7 + $0x32]] }
  0x60   : > { %3095 = vst [vmem:[#allocation15_spill] sm:$0xff] %v1950_v43  ;;  %v270_v44 = vrot.slane %v3058_v3, 5  ;;  %vm273_vm1 = vcmp.lt.s32.totalorder %v1950_v43, 3  ;;  %v415_v58 = vrot.slane %v3058_v3, 6  ;;  %vm416_vm2 = vcmp.lt.s32.totalorder %v1950_v43, 2  ;;  %s2208_s15 = sld [smem:[#allocation7 + $0x34]] }
  0x61   : > { %v243_v37 = vmax.f32 %v240_v35, %v242_v36  ;;  %v250_v38 = vld [vmem:[#allocation2 + $0x18] sm:$0xff]  ;;  %249 = vst.msk [vmem:[#allocation2 + $0x8] sm:$0xff] %vm204_vm0, %v229_v33  ;;  %v558_v4 = vrot.slane %v3058_v3, 7  ;;  %vm559_vm3 = vcmp.lt.s32.totalorder %v1950_v43, 1  ;;  %s2214_s16 = sld [smem:[#allocation7 + $0xa]]  ;;  %s2216_s23 = sld [smem:[#allocation7 + $0x36]] }
  0x62   : > { %v251_v39 = vld [vmem:[#allocation2 + $0x20] sm:$0xff]  ;;  %v252_v41 = vmax.f32 %v250_v38, %v236_v34  ;;  %s2220_s30 = sld [smem:[#allocation7 + $0x8]]  ;;  %s2228_s5 = sld [smem:[#allocation7 + $0x39]]  ;;  %vm834_vm4 = vcmp.lt.s32.totalorder %v1950_v43, 7  ;;  %vm977_vm5 = vcmp.lt.s32.totalorder %v1950_v43, 6 }
  0x63   : > { %v253_v42 = vmax.f32 %v251_v39, %v243_v37  ;;  %s2233_s6 = sld [smem:[#allocation7 + $0x3b]]  ;;  %s1422_s7 = sld [smem:[#allocation7 + $0xc]] }
  0x64   : > { %254 = vst.msk [vmem:[#allocation2 + $0x18] sm:$0xff] %vm204_vm0, %v252_v41  ;;  %v307_v37 = vstv %s1400_s28  ;;  %v339_v38 = vstv %s1404_s8  ;;  %s1432_s28 = sld [smem:[#allocation7 + $0x11]]  ;;  %s1423_s8 = sld [smem:[#allocation7 + $0x3d]] }
  0x65   : > { %255 = vst.msk [vmem:[#allocation2 + $0x20] sm:$0xff] %vm204_vm0, %v253_v42  ;;  %v379_v40 = vstv %s2200_s17  ;;  %s1428_s17 = sld [smem:[#allocation7 + $0xf]]  ;;  %s2466_s1 = sld [smem:[#allocation7 + $0x10]] }
  0x66   : > { %v1953_v45 = vld [vmem:[#allocation2] sm:$0xff]  ;;  %s2461_s0 = sld [smem:[#allocation7 + $0x3f]]  ;;  %s2468_s29 = sld [smem:[#allocation7 + $0x41]] }
  0x67   : > { %v265_v46 = vrot.slane %v1953_v45, 5  ;;  %v410_v57 = vrot.slane %v1953_v45, 6  ;;  %v553_v2 = vrot.slane %v1953_v45, 7  ;;  %s3108_s13 = smov 3   ;;  %s2485_s25 = sld [smem:[#allocation7 + $0x43]] }
  0x68   : > { %v1957_v47 = vld [vmem:[#allocation2 + $0x8] sm:$0xff]  ;;  %p3140_p2 = scmp.ne.s32.totalorder %s3083_s21, 0 }
  0x69   : > { %v266_v48 = vrot.slane %v1957_v47, 5  ;;  %v1962_v49 = vsel %vm273_vm1, %v270_v44, %v265_v46  ;;  %v411_v59 = vrot.slane %v1957_v47, 6  ;;  %v2034_v60 = vsel %vm416_vm2, %v415_v58, %v410_v57 }
  0x6a   : > { %278 = vrot.lane.b32.xlu0 %v1962_v49, %s3067_s18  ;;  %v554_v5 = vrot.slane %v1957_v47, 7  ;;  %v2096_v6 = vsel %vm559_vm3, %v558_v4, %v553_v2  ;;  %v340_v41 = vmul.f32 %v339_v38, %v1962_v49 }
  0x6b   : > { %v1964_v50 = vld [vmem:[#allocation2 + $0x18] sm:$0xff]  ;;  %v1970_v51 = vsel %vm273_vm1, %v265_v46, %v266_v48  ;;  %v2037_v62 = vsel %vm416_vm2, %v410_v57, %v411_v59  ;;  %v313_v48 = vstv %s2206_s3  ;;  %v482_v59 = vstv %s2214_s16  ;;  %s2353_s3 = sld [smem:[#allocation7 + $0x40]] }
  0x6c   : > { %300 = vrot.lane.b32.xlu1 %v1970_v51, %s3061_s20  ;;  %v268_v52 = vrot.slane %v1964_v50, 5  ;;  %v1975_v53 = vld [vmem:[#allocation2 + $0x20] sm:$0xff]  ;;  %v413_v61 = vrot.slane %v1964_v50, 6  ;;  %v556_v7 = vrot.slane %v1964_v50, 7  ;;  %v2099_v8 = vsel %vm559_vm3, %v553_v2, %v554_v5  ;;  %s2393_s16 = sld [smem:[#allocation7]] }
  0x6d   : > { %v269_v55 = vrot.slane %v1975_v53, 5  ;;  %v414_v63 = vrot.slane %v1975_v53, 6  ;;  %v557_v9 = vrot.slane %v1975_v53, 7  ;;  %v341_v46 = vmul.f32 %v339_v38, %v1970_v51 }
  0x6e   : > { %280 = vrot.lane.b32.xlu0 %v1970_v51, %s3067_s18  ;;  %v1983_v54 = vsel %vm273_vm1, %v270_v44, %v268_v52  ;;  %v2044_v0 = vsel %vm416_vm2, %v415_v58, %v413_v61  ;;  %v2106_v10 = vsel %vm559_vm3, %v558_v4, %v556_v7 }
  0x6f   : > { %v1992_v56 = vsel %vm273_vm1, %v268_v52, %v269_v55  ;;  %v2046_v1 = vsel %vm416_vm2, %v413_v61, %v414_v63  ;;  %v2108_v11 = vsel %vm559_vm3, %v556_v7, %v557_v9  ;;  %v345_v52 = vstv %s2208_s15  ;;  %s2357_s15 = sld [smem:[#allocation7 + $0x42]] }
  0x70   : > { %320 = vrot.lane.b32.xlu1 %v1970_v51, %s3063_s26  ;;  %v385_v63 = vstv %s2216_s23  ;;  %v347_v4 = vmul.f32 %v345_v52, %v1992_v56  ;;  %s2395_s23 = sld [smem:[#allocation7 + $0x2]] }
  0x72   : > { %298 = vrot.lane.b32.xlu0 %v1962_v49, %s3061_s20 }
  0x74   : > { %282 = vrot.lane.b32.xlu1 %v1983_v54, %s3067_s18 }
  0x76   : > { %318 = vrot.lane.b32.xlu0 %v1962_v49, %s3063_s26 }
  0x78   : > { %284 = vrot.lane.b32.xlu1 %v1992_v56, %s3067_s18 }
  0x7a   : > { %302 = vrot.lane.b32.xlu0 %v1983_v54, %s3061_s20 }
  0x7c   : > { %304 = vrot.lane.b32.xlu1 %v1992_v56, %s3061_s20 }
  0x7e   : > { %322 = vrot.lane.b32.xlu0 %v1983_v54, %s3063_s26 }
  0x80   : > { %324 = vrot.lane.b32.xlu1 %v1992_v56, %s3063_s26 }
  0x82   : > { %350 = vrot.lane.b32.xlu0 %v1962_v49, %s3059_s27 }
  0x84   : > { %352 = vrot.lane.b32.xlu1 %v1970_v51, %s3059_s27 }
  0x86   : > { %354 = vrot.lane.b32.xlu0 %v1983_v54, %s3059_s27 }
  0x88   : > { %356 = vrot.lane.b32.xlu1 %v1992_v56, %s3059_s27 }
  0x8a   : > { %370 = vrot.lane.b32.xlu0 %v1962_v49, %s3065_s19 }
  0x8c   : > { %372 = vrot.lane.b32.xlu1 %v1970_v51, %s3065_s19 }
  0x8e   : > { %374 = vrot.lane.b32.xlu0 %v1983_v54, %s3065_s19 }
  0x90   : > { %376 = vrot.lane.b32.xlu1 %v1992_v56, %s3065_s19 }
  0x92   : > { %390 = vrot.lane.b32.xlu0 %v1962_v49, %s3069_s24  ;;  %v450_v49 = vstv %s2220_s30  ;;  %s2401_s30 = sld [smem:[#allocation7 + $0x31]] }
  0x94   : > { %392 = vrot.lane.b32.xlu1 %v1970_v51, %s3069_s24  ;;  %v346_v51 = vmul.f32 %v345_v52, %v1983_v54 }
  0x96   : > { %394 = vrot.lane.b32.xlu0 %v1983_v54, %s3069_s24 }
  0x98   : > { %396 = vrot.lane.b32.xlu1 %v1992_v56, %s3069_s24 }
  0x9a   : > { %421 = vrot.lane.b32.xlu0 %v2034_v60, %s3067_s18 }
  0x9c   : > { %423 = vrot.lane.b32.xlu1 %v2037_v62, %s3067_s18 }
  0x9e   : > { %425 = vrot.lane.b32.xlu0 %v2044_v0, %s3067_s18 }
  0xa0   : > { %427 = vrot.lane.b32.xlu1 %v2046_v1, %s3067_s18 }
  0xa2   : > { %441 = vrot.lane.b32.xlu0 %v2034_v60, %s3061_s20 }
  0xa4   : > { %443 = vrot.lane.b32.xlu1 %v2037_v62, %s3061_s20 }
  0xa6   : > { %445 = vrot.lane.b32.xlu0 %v2044_v0, %s3061_s20 }
  0xa8   : > { %447 = vrot.lane.b32.xlu1 %v2046_v1, %s3061_s20 }
  0xaa   : > { %461 = vrot.lane.b32.xlu0 %v2034_v60, %s3063_s26 }
  0xac   : > { %463 = vrot.lane.b32.xlu1 %v2037_v62, %s3063_s26 }
  0xae   : > { %465 = vrot.lane.b32.xlu0 %v2044_v0, %s3063_s26 }
  0xb0   : > { %467 = vrot.lane.b32.xlu1 %v2046_v1, %s3063_s26 }
  0xb2   : > { %493 = vrot.lane.b32.xlu0 %v2034_v60, %s3059_s27 }
  0xb4   : > { %495 = vrot.lane.b32.xlu1 %v2037_v62, %s3059_s27 }
  0xb6   : > { %497 = vrot.lane.b32.xlu0 %v2044_v0, %s3059_s27 }
  0xb8   : > { %499 = vrot.lane.b32.xlu1 %v2046_v1, %s3059_s27 }
  0xba   : > { %513 = vrot.lane.b32.xlu0 %v2034_v60, %s3065_s19 }
  0xbc   : > { %515 = vrot.lane.b32.xlu1 %v2037_v62, %s3065_s19 }
  0xbe   : > { %517 = vrot.lane.b32.xlu0 %v2044_v0, %s3065_s19 }
  0xc0   : > { %519 = vrot.lane.b32.xlu1 %v2046_v1, %s3065_s19 }
  0xc2   : > { %533 = vrot.lane.b32.xlu0 %v2034_v60, %s3069_s24 }
  0xc4   : > { %535 = vrot.lane.b32.xlu1 %v2037_v62, %s3069_s24 }
  0xc6   : > { %537 = vrot.lane.b32.xlu0 %v2044_v0, %s3069_s24 }
  0xc8   : > { %539 = vrot.lane.b32.xlu1 %v2046_v1, %s3069_s24 }
  0xca   : > { %564 = vrot.lane.b32.xlu0 %v2096_v6, %s3067_s18 }
  0xcc   : > { %566 = vrot.lane.b32.xlu1 %v2099_v8, %s3067_s18 }
  0xce   : > { %568 = vrot.lane.b32.xlu0 %v2106_v10, %s3067_s18 }
  0xd0   : > { %570 = vrot.lane.b32.xlu1 %v2108_v11, %s3067_s18 }
  0xd2   : > { %584 = vrot.lane.b32.xlu0 %v2096_v6, %s3061_s20 }
  0xd4   : > { %586 = vrot.lane.b32.xlu1 %v2099_v8, %s3061_s20 }
  0xd6   : > { %588 = vrot.lane.b32.xlu0 %v2106_v10, %s3061_s20 }
  0xd8   : > { %590 = vrot.lane.b32.xlu1 %v2108_v11, %s3061_s20 }
  0xda   : > { %604 = vrot.lane.b32.xlu0 %v2096_v6, %s3063_s26 }
  0xdc   : > { %606 = vrot.lane.b32.xlu1 %v2099_v8, %s3063_s26  ;;  %v2126_v12 = vpop.permute.xlu0 %278 }
  0xde   : > { %v2128_v13 = vpop.permute.xlu1 %300  ;;  %608 = vrot.lane.b32.xlu0 %v2106_v10, %s3063_s26 }
  0xdf   : > { %v309_v44 = vmul.f32 %v307_v37, %v2128_v13 }
  0xe0   : > { %610 = vrot.lane.b32.xlu1 %v2108_v11, %s3063_s26  ;;  %v2134_v14 = vpop.permute.xlu0 %280 }
  0xe1   : > { %v343_v7 = vadd.f32 %v341_v46, %v309_v44 }
  0xe2   : > { %v2136_v15 = vpop.permute.xlu1 %320  ;;  %636 = vrot.lane.b32.xlu0 %v2096_v6, %s3059_s27 }
  0xe4   : > { %638 = vrot.lane.b32.xlu1 %v2099_v8, %s3059_s27  ;;  %v299_v16 = vpop.permute.xlu0 %298 }
  0xe5   : > { %v308_v42 = vmul.f32 %v307_v37, %v299_v16  ;;  %v484_v16 = vmul.f32 %v482_v59, %v2037_v62 }
  0xe6   : > { %v2142_v17 = vpop.permute.xlu1 %282  ;;  %640 = vrot.lane.b32.xlu0 %v2106_v10, %s3059_s27 }
  0xe7   : > { %v342_v2 = vadd.f32 %v340_v41, %v308_v42  ;;  %v488_v42 = vstv %s2233_s6  ;;  %s2409_s6 = sld [smem:[#allocation7 + $0x4]] }
  0xe8   : > { %642 = vrot.lane.b32.xlu1 %v2108_v11, %s3059_s27  ;;  %v2148_v18 = vpop.permute.xlu0 %318 }
  0xea   : > { %v2150_v19 = vpop.permute.xlu1 %284  ;;  %656 = vrot.lane.b32.xlu0 %v2096_v6, %s3065_s19 }
  0xec   : > { %658 = vrot.lane.b32.xlu1 %v2099_v8, %s3065_s19  ;;  %v2156_v20 = vpop.permute.xlu0 %302 }
  0xed   : > { %v314_v5 = vmul.f32 %v313_v48, %v2156_v20 }
  0xee   : > { %v2158_v21 = vpop.permute.xlu1 %304  ;;  %660 = vrot.lane.b32.xlu0 %v2106_v10, %s3065_s19 }
  0xef   : > { %v315_v9 = vmul.f32 %v313_v48, %v2158_v21  ;;  %v348_v44 = vadd.f32 %v346_v51, %v314_v5 }
  0xf0   : > { %662 = vrot.lane.b32.xlu1 %v2108_v11, %s3065_s19  ;;  %v2164_v22 = vpop.permute.xlu0 %322 }
  0xf1   : > { %v349_v62 = vadd.f32 %v347_v4, %v315_v9 }
  0xf2   : > { %v2166_v23 = vpop.permute.xlu1 %324  ;;  %676 = vrot.lane.b32.xlu0 %v2096_v6, %s3069_s24 }
  0xf4   : > { %678 = vrot.lane.b32.xlu1 %v2099_v8, %s3069_s24  ;;  %v2172_v24 = vpop.permute.xlu0 %350 }
  0xf6   : > { %v2174_v25 = vpop.permute.xlu1 %352  ;;  %680 = vrot.lane.b32.xlu0 %v2106_v10, %s3069_s24 }
  0xf8   : > { %682 = vrot.lane.b32.xlu1 %v2108_v11, %s3069_s24  ;;  %v2180_v26 = vpop.permute.xlu0 %354 }
  0xfa   : > { %v2182_v27 = vpop.permute.xlu1 %356  ;;  %696 = vrot.lane.b32.xlu0 %v1953_v45, %s3067_s18 }
  0xfc   : > { %698 = vrot.lane.b32.xlu1 %v1957_v47, %s3067_s18  ;;  %v371_v28 = vpop.permute.xlu0 %370 }
  0xfd   : > { %v380_v57 = vmul.f32 %v379_v40, %v371_v28  ;;  %v483_v28 = vmul.f32 %v482_v59, %v2034_v60 }
  0xfe   : > { %v373_v29 = vpop.permute.xlu1 %372  ;;  %700 = vrot.lane.b32.xlu0 %v1964_v50, %s3067_s18 }
  0xff   : > { %v381_v61 = vmul.f32 %v379_v40, %v373_v29  ;;  %v382_v29 = vadd.f32 %v380_v57, %v342_v2  ;;  %v456_v40 = vstv %s2228_s5  ;;  %s2403_s5 = sld [smem:[#allocation7 + $0x33]] }
 0x100   : > { %702 = vrot.lane.b32.xlu1 %v1975_v53, %s3067_s18  ;;  %v375_v30 = vpop.permute.xlu0 %374 }
 0x101   : > { %v386_v37 = vmul.f32 %v385_v63, %v375_v30  ;;  %v383_v54 = vadd.f32 %v381_v61, %v343_v7 }
 0x102   : > { %v377_v31 = vpop.permute.xlu1 %376  ;;  %716 = vrot.lane.b32.xlu0 %v1953_v45, %s3061_s20 }
 0x103   : > { %v387_v41 = vmul.f32 %v385_v63, %v377_v31  ;;  %v388_v48 = vadd.f32 %v386_v37, %v348_v44  ;;  %v489_v31 = vmul.f32 %v488_v42, %v2044_v0 }
 0x104   : > { %718 = vrot.lane.b32.xlu1 %v1957_v47, %s3061_s20  ;;  %v2196_v32 = vpop.permute.xlu0 %390 }
 0x105   : > { %v389_v59 = vadd.f32 %v387_v41, %v349_v62 }
 0x106   : > { %v2198_v33 = vpop.permute.xlu1 %392  ;;  %720 = vrot.lane.b32.xlu0 %v1964_v50, %s3061_s20 }
 0x108   : > { %722 = vrot.lane.b32.xlu1 %v1975_v53, %s3061_s20  ;;  %v2210_v34 = vpop.permute.xlu0 %394 }
 0x10a   : > { %v2212_v35 = vpop.permute.xlu1 %396  ;;  %736 = vrot.lane.b32.xlu0 %v1953_v45, %s3063_s26 }
 0x10c   : > { %738 = vrot.lane.b32.xlu1 %v1957_v47, %s3063_s26  ;;  %v2224_v36 = vpop.permute.xlu0 %421 }
 0x10e   : > { %v2226_v39 = vpop.permute.xlu1 %423  ;;  %740 = vrot.lane.b32.xlu0 %v1964_v50, %s3063_s26 }
 0x110   : > { %742 = vrot.lane.b32.xlu1 %v1975_v53, %s3063_s26  ;;  %v2242_v55 = vpop.permute.xlu0 %425 }
 0x112   : > { %v2244_v58 = vpop.permute.xlu1 %427  ;;  %768 = vrot.lane.b32.xlu0 %v1953_v45, %s3059_s27 }
 0x114   : > { %770 = vrot.lane.b32.xlu1 %v1957_v47, %s3059_s27  ;;  %v442_v13 = vpop.permute.xlu0 %441 }
 0x115   : > { %v451_v56 = vmul.f32 %v450_v49, %v442_v13  ;;  %v829_v13 = vrot.slane %v1957_v47, 1 }
 0x116   : > { %v444_v38 = vpop.permute.xlu1 %443  ;;  %772 = vrot.lane.b32.xlu0 %v1964_v50, %s3059_s27 }
 0x117   : > { %v452_v20 = vmul.f32 %v450_v49, %v444_v38  ;;  %v453_v46 = vadd.f32 %v451_v56, %v382_v29  ;;  %v490_v49 = vmul.f32 %v488_v42, %v2046_v1  ;;  %v830_v29 = vrot.slane %v3058_v3, 1 }
 0x118   : > { %774 = vrot.lane.b32.xlu1 %v1975_v53, %s3059_s27  ;;  %v446_v60 = vpop.permute.xlu0 %445  ;;  %v832_v56 = vrot.slane %v1975_v53, 1 }
 0x119   : > { %v454_v21 = vadd.f32 %v452_v20, %v383_v54  ;;  %v457_v52 = vmul.f32 %v456_v40, %v446_v60  ;;  %v2265_v57 = vadd.f32 %v483_v28, %v453_v46  ;;  %v2313_v41 = vsel %vm834_vm4, %v829_v13, %v830_v29 }
 0x11a   : > { %v448_v30 = vpop.permute.xlu1 %447  ;;  %788 = vrot.lane.b32.xlu0 %v1953_v45, %s3065_s19  ;;  %3101 = vst [vmem:[#allocation21_spill] sm:$0xff] %v2313_v41  ;;  %v2323_v46 = vsel %vm834_vm4, %v832_v56, %v830_v29 }
 0x11b   : > { %v458_v61 = vmul.f32 %v456_v40, %v448_v30  ;;  %v2270_v63 = vadd.f32 %v484_v16, %v454_v21  ;;  %v459_v2 = vadd.f32 %v457_v52, %v388_v48  ;;  %v828_v16 = vrot.slane %v1953_v45, 1 }
 0x11c   : > { %790 = vrot.lane.b32.xlu1 %v1957_v47, %s3065_s19  ;;  %v2275_v51 = vpop.permute.xlu0 %461  ;;  %v831_v40 = vrot.slane %v1964_v50, 1 }
 0x11d   : > { %v460_v4 = vadd.f32 %v458_v61, %v389_v59  ;;  %3096 = vst [vmem:[#allocation16_spill] sm:$0xff] %v2275_v51  ;;  %v2279_v7 = vadd.f32 %v489_v31, %v459_v2  ;;  %v2307_v38 = vsel %vm834_vm4, %v828_v16, %v829_v13  ;;  %v625_v16 = vstv %s1432_s28  ;;  %s2417_s28 = sld [smem:[#allocation7 + $0x6]] }
 0x11e   : > { %v2277_v5 = vpop.permute.xlu1 %463  ;;  %792 = vrot.lane.b32.xlu0 %v1964_v50, %s3065_s19  ;;  %3100 = vst [vmem:[#allocation20_spill] sm:$0xff] %v2307_v38  ;;  %v2321_v42 = vsel %vm834_vm4, %v831_v40, %v832_v56  ;;  %v528_v56 = vstv %s1423_s8  ;;  %v593_v40 = vstv %s1428_s17  ;;  %v631_v51 = vstv %s2357_s15  ;;  %s2419_s8 = sld [smem:[#allocation7 + $0x37]]  ;;  %s2431_s15 = sld [smem:[#allocation7 + $0x9]] }
 0x11f   : > { %3097 = vst [vmem:[#allocation17_spill] sm:$0xff] %v2277_v5  ;;  %v2283_v0 = vadd.f32 %v490_v49, %v460_v4  ;;  %v522_v49 = vstv %s1422_s7  ;;  %s2411_s7 = sld [smem:[#allocation7 + $0x35]]  ;;  %s2425_s17 = sld [smem:[#allocation7 + $0x7]] }
 0x120   : > { %794 = vrot.lane.b32.xlu1 %v1975_v53, %s3065_s19  ;;  %v2287_v1 = vpop.permute.xlu0 %465 }
 0x122   : > { %v2289_v9 = vpop.permute.xlu1 %467  ;;  %808 = vrot.lane.b32.xlu0 %v1953_v45, %s3069_s24 }
 0x124   : > { %810 = vrot.lane.b32.xlu1 %v1957_v47, %s3069_s24  ;;  %v2297_v28 = vpop.permute.xlu0 %493 }
 0x125   : > { %3098 = vst [vmem:[#allocation18_spill] sm:$0xff] %v2297_v28 }
 0x126   : > { %v2301_v37 = vpop.permute.xlu1 %495  ;;  %812 = vrot.lane.b32.xlu0 %v1964_v50, %s3069_s24 }
 0x127   : > { %3099 = vst [vmem:[#allocation19_spill] sm:$0xff] %v2301_v37 }
 0x128   : > { %814 = vrot.lane.b32.xlu1 %v1975_v53, %s3069_s24  ;;  %v2311_v54 = vpop.permute.xlu0 %497 }
 0x12a   : > { %v2315_v20 = vpop.permute.xlu1 %499  ;;  %839 = vrot.lane.b32.xlu0 %v2307_v38, %s3067_s18 }
 0x12c   : > { %841 = vrot.lane.b32.xlu1 %v2313_v41, %s3067_s18  ;;  %v514_v44 = vpop.permute.xlu0 %513 }
 0x12d   : > { %v523_v4 = vmul.f32 %v522_v49, %v514_v44 }
 0x12e   : > { %v516_v62 = vpop.permute.xlu1 %515  ;;  %843 = vrot.lane.b32.xlu0 %v2321_v42, %s3067_s18 }
 0x12f   : > { %v524_v29 = vmul.f32 %v522_v49, %v516_v62  ;;  %v525_v44 = vadd.f32 %v523_v4, %v2265_v57  ;;  %v599_v62 = vstv %s2353_s3  ;;  %s2427_s3 = sld [smem:[#allocation7 + $0x38]] }
 0x130   : > { %845 = vrot.lane.b32.xlu1 %v2323_v46, %s3067_s18  ;;  %v518_v21 = vpop.permute.xlu0 %517  ;;  %s2451_s18 = sld [smem:[#allocation7 + $0x3e]] }
 0x131   : > { %v526_v49 = vadd.f32 %v524_v29, %v2270_v63  ;;  %v632_v63 = vmul.f32 %v631_v51, %v2106_v10 }
 0x132   : > { %v520_v60 = vpop.permute.xlu1 %519  ;;  %859 = vrot.lane.b32.xlu0 %v2307_v38, %s3061_s20 }
 0x133   : > { %v530_v28 = vmul.f32 %v528_v56, %v520_v60 }
 0x134   : > { %861 = vrot.lane.b32.xlu1 %v2313_v41, %s3061_s20  ;;  %v2333_v48 = vpop.permute.xlu0 %533 }
 0x135   : > { %3102 = vst [vmem:[#allocation22_spill] sm:$0xff] %v2333_v48  ;;  %v532_v60 = vadd.f32 %v530_v28, %v2283_v0  ;;  %v971_v28 = vrot.slane %v1953_v45, 2 }
 0x136   : > { %v2335_v30 = vpop.permute.xlu1 %535  ;;  %863 = vrot.lane.b32.xlu0 %v2321_v42, %s3061_s20 }
 0x137   : > { %3103 = vst [vmem:[#allocation23_spill] sm:$0xff] %v2335_v30  ;;  %v529_v30 = vmul.f32 %v528_v56, %v518_v21  ;;  %v974_v56 = vrot.slane %v1964_v50, 2  ;;  %v333_v50 = vstv %s2403_s5  ;;  %s2483_s5 = sld [smem:[#allocation7 + $0x12]] }
 0x138   : > { %865 = vrot.lane.b32.xlu1 %v2323_v46, %s3061_s20  ;;  %v2341_v52 = vpop.permute.xlu0 %537  ;;  %s2437_s20 = sld [smem:[#allocation7 + $0xb]] }
 0x139   : > { %v531_v57 = vadd.f32 %v529_v30, %v2279_v7 }
 0x13a   : > { %v2343_v31 = vpop.permute.xlu1 %539  ;;  %879 = vrot.lane.b32.xlu0 %v2307_v38, %s3063_s26 }
 0x13c   : > { %881 = vrot.lane.b32.xlu1 %v2313_v41, %s3063_s26  ;;  %v2349_v59 = vpop.permute.xlu0 %564 }
 0x13d   : > { %3104 = vst [vmem:[#allocation24_spill] sm:$0xff] %v2349_v59  ;;  %v627_v59 = vmul.f32 %v625_v16, %v2099_v8 }
 0x13e   : > { %v2351_v61 = vpop.permute.xlu1 %566  ;;  %883 = vrot.lane.b32.xlu0 %v2321_v42, %s3063_s26 }
 0x13f   : > { %3105 = vst [vmem:[#allocation25_spill] sm:$0xff] %v2351_v61  ;;  %v626_v61 = vmul.f32 %v625_v16, %v2096_v6  ;;  %v633_v16 = vmul.f32 %v631_v51, %v2108_v11  ;;  %v972_v51 = vrot.slane %v1957_v47, 2  ;;  %v975_v47 = vrot.slane %v1975_v53, 2 }
 0x140   : > { %885 = vrot.lane.b32.xlu1 %v2323_v46, %s3063_s26  ;;  %v2361_v2 = vpop.permute.xlu0 %568  ;;  %s2439_s26 = sld [smem:[#allocation7 + $0x3c]] }
 0x141   : > { %v2445_v45 = vsel %vm977_vm5, %v971_v28, %v972_v51  ;;  %v436_v28 = vstv %s2427_s3  ;;  %s2730_s3 = sld [smem:[#allocation7 + $0x1a]] }
 0x142   : > { %v2363_v13 = vpop.permute.xlu1 %570  ;;  %911 = vrot.lane.b32.xlu0 %v2307_v38, %s3059_s27 }
 0x143   : > { %3106 = vst [vmem:[#allocation26_spill] sm:$0xff] %v2363_v13 }
 0x144   : > { %913 = vrot.lane.b32.xlu1 %v2313_v41, %s3059_s27  ;;  %v585_v3 = vpop.permute.xlu0 %584 }
 0x145   : > { %v594_v37 = vmul.f32 %v593_v40, %v585_v3 }
 0x146   : > { %v587_v48 = vpop.permute.xlu1 %586  ;;  %915 = vrot.lane.b32.xlu0 %v2321_v42, %s3059_s27 }
 0x147   : > { %v595_v5 = vmul.f32 %v593_v40, %v587_v48  ;;  %v596_v13 = vadd.f32 %v594_v37, %v525_v44 }
 0x148   : > { %917 = vrot.lane.b32.xlu1 %v2323_v46, %s3059_s27  ;;  %v589_v6 = vpop.permute.xlu0 %588  ;;  %s2433_s27 = sld [smem:[#allocation7 + $0x3a]] }
 0x149   : > { %v597_v8 = vadd.f32 %v595_v5, %v526_v49  ;;  %v600_v4 = vmul.f32 %v599_v62, %v589_v6  ;;  %v2380_v3 = vadd.f32 %v626_v61, %v596_v13  ;;  %v3107_v61 = vmov 0.0  }
 0x14a   : > { %v591_v21 = vpop.permute.xlu1 %590  ;;  %931 = vrot.lane.b32.xlu0 %v2307_v38, %s3065_s19  ;;  %v973_v13 = vrot.slane %v3107_v61, 2  ;;  %v327_v49 = vstv %s2395_s23  ;;  %v293_v6 = vstv %s2401_s30  ;;  %s2507_s23 = sld [smem:[#allocation7 + $0x44]] }
 0x14b   : > { %v601_v48 = vmul.f32 %v599_v62, %v591_v21  ;;  %v2386_v37 = vadd.f32 %v627_v59, %v597_v8  ;;  %v602_v5 = vadd.f32 %v600_v4, %v531_v57  ;;  %v287_v62 = vstv %s2393_s16  ;;  %s2505_s16 = sld [smem:[#allocation7 + $0x13]]  ;;  %s2585_s30 = sld [smem:[#allocation7 + $0x14]] }
 0x14c   : > { %933 = vrot.lane.b32.xlu1 %v2313_v41, %s3065_s19  ;;  %v2391_v30 = vpop.permute.xlu0 %604  ;;  %s2449_s19 = sld [smem:[#allocation7 + $0xd]]  ;;  %v2457_v44 = vsel %vm977_vm5, %v972_v51, %v973_v13  ;;  %v2478_v8 = vsel %vm977_vm5, %v974_v56, %v975_v47  ;;  %v365_v21 = vstv %s2411_s7  ;;  %v335_v51 = vmul.f32 %v333_v50, %v2166_v23  ;;  %s3122_s7 = smov 2  }
 0x14d   : > { %v603_v7 = vadd.f32 %v601_v48, %v532_v60  ;;  %v2399_v0 = vadd.f32 %v632_v63, %v602_v5  ;;  %v2491_v63 = vsel %vm977_vm5, %v975_v47, %v973_v13  ;;  %v334_v60 = vmul.f32 %v333_v50, %v2164_v22 }
 0x14e   : > { %v2397_v10 = vpop.permute.xlu1 %606  ;;  %951 = vrot.lane.b32.xlu0 %v2307_v38, %s3069_s24  ;;  %v476_v56 = vstv %s2433_s27  ;;  %v294_v22 = vmul.f32 %v293_v6, %v2142_v17  ;;  %v366_v13 = vmul.f32 %v365_v21, %v2180_v26  ;;  %v508_v5 = vstv %s2439_s26  ;;  %s2521_s27 = sld [smem:[#allocation7 + $0x45]]  ;;  %s3109_s26 = smov 126  }
 0x14f   : > { %v2407_v11 = vadd.f32 %v633_v16, %v603_v7  ;;  %v405_v16 = vstv %s2419_s8  ;;  %v295_v23 = vmul.f32 %v293_v6, %v2150_v19  ;;  %v367_v50 = vmul.f32 %v365_v21, %v2182_v27  ;;  %s2721_s8 = sld [smem:[#allocation7 + $0x4a]] }
 0x150   : > { %953 = vrot.lane.b32.xlu1 %v2313_v41, %s3069_s24  ;;  %v2421_v59 = vpop.permute.xlu0 %608  ;;  %v548_v48 = vstv %s2451_s18  ;;  %v336_v17 = vadd.f32 %v334_v60, %v294_v22  ;;  %v406_v26 = vmul.f32 %v405_v16, %v2210_v34  ;;  %v579_v41 = vstv %s2461_s0  ;;  %s2533_s18 = sld [smem:[#allocation7 + $0x46]]  ;;  %s3110_s0 = smov 1  }
 0x151   : > { %v337_v43 = vadd.f32 %v335_v51, %v295_v23  ;;  %v407_v19 = vmul.f32 %v405_v16, %v2212_v35  ;;  %v619_v27 = vstv %s2468_s29  ;;  %v329_v21 = vmul.f32 %v327_v49, %v2136_v15  ;;  %s2619_s29 = sld [smem:[#allocation7 + $0x47]] }
 0x152   : > { %v2429_v29 = vpop.permute.xlu1 %610  ;;  %955 = vrot.lane.b32.xlu0 %v2321_v42, %s3069_s24  ;;  %v542_v61 = vstv %s2449_s19  ;;  %v289_v34 = vmul.f32 %v287_v62, %v2134_v14  ;;  %v368_v60 = vadd.f32 %v366_v13, %v336_v17  ;;  %v437_v22 = vmul.f32 %v436_v28, %v2242_v55  ;;  %s3136_s19 = smov 125  }
 0x153   : > { %v369_v35 = vadd.f32 %v367_v50, %v337_v43  ;;  %v438_v16 = vmul.f32 %v436_v28, %v2244_v58  ;;  %v645_v51 = vstv %s2483_s5  ;;  %v651_v23 = vstv %s2485_s25  ;;  %s2649_s25 = sld [smem:[#allocation7 + $0x17]]  ;;  %s2743_s5 = sld [smem:[#allocation7 + $0x4b]] }
 0x154   : > { %957 = vrot.lane.b32.xlu1 %v2323_v46, %s3069_s24  ;;  %v2453_v40 = vpop.permute.xlu0 %636  ;;  %s2459_s24 = sld [smem:[#allocation7 + $0xe]]  ;;  %v288_v15 = vmul.f32 %v287_v62, %v2126_v12  ;;  %v328_v14 = vmul.f32 %v327_v49, %v2148_v18  ;;  %v408_v13 = vadd.f32 %v406_v26, %v368_v60  ;;  %v477_v17 = vmul.f32 %v476_v56, %v2287_v1 }
 0x155   : > { %v409_v47 = vadd.f32 %v407_v19, %v369_v35  ;;  %v478_v43 = vmul.f32 %v476_v56, %v2289_v9  ;;  %v665_v58 = vstv %s2505_s16  ;;  %v671_v28 = vstv %s2507_s23  ;;  %s2759_s16 = sld [smem:[#allocation7 + $0x1b]]  ;;  %s1453_s23 = sld [smem:[#allocation7 + $0x4c]] }
 0x156   : > { %v2463_v53 = vpop.permute.xlu1 %638  ;;  %982 = vrot.lane.b32.xlu0 %v2445_v45, %s3108_s13  ;;  %v331_v50 = vadd.f32 %v329_v21, %v289_v34  ;;  %v3111_v12 = vstv %s2409_s6  ;;  %v439_v62 = vadd.f32 %v437_v22, %v408_v13  ;;  %v509_v1 = vmul.f32 %v508_v5, %v2311_v54  ;;  %s2589_s6 = sld [smem:[#allocation7 + $0x16]] }
 0x157   : > { %v360_v18 = vmul.f32 %v3111_v12, %v2172_v24  ;;  %v3112_v49 = vmov %v3111_v12  ;;  %v440_v56 = vadd.f32 %v438_v16, %v409_v47  ;;  %v510_v26 = vmul.f32 %v508_v5, %v2315_v20 }
 0x158   : > { %984 = vrot.lane.b32.xlu1 %v2457_v44, %s3108_s13  ;;  %v2487_v4 = vpop.permute.xlu0 %640  ;;  %v361_v9 = vmul.f32 %v3112_v49, %v2174_v25  ;;  %v691_v21 = vstv %s2521_s27  ;;  %v330_v34 = vadd.f32 %v328_v14, %v288_v15  ;;  %v3113_v24 = vstv %s2417_s28  ;;  %s2617_s28 = sld [smem:[#allocation7 + $0x15]]  ;;  %s1454_s27 = sld [smem:[#allocation7 + $0x1c]] }
 0x159   : > { %v400_v60 = vmul.f32 %v3113_v24, %v2196_v32  ;;  %v479_v22 = vadd.f32 %v477_v17, %v439_v62  ;;  %v549_v54 = vmul.f32 %v548_v48, %v2341_v52  ;;  %v3114_v13 = vmov %v3113_v24  ;;  %v3117_v17 = vld [vmem:[#allocation26_spill] sm:$0xff] }
 0x15a   : > { %v2497_v7 = vpop.permute.xlu1 %642  ;;  %986 = vrot.lane.b32.xlu0 %v2478_v8, %s3108_s13  ;;  %v401_v25 = vmul.f32 %v3114_v13, %v2198_v33  ;;  %v480_v12 = vadd.f32 %v478_v43, %v440_v56  ;;  %v550_v47 = vmul.f32 %v548_v48, %v2343_v31  ;;  %v711_v20 = vstv %s2533_s18  ;;  %s2799_s18 = sld [smem:[#allocation7 + $0x1d]] }
 0x15b   : > { %v362_v5 = vadd.f32 %v360_v18, %v330_v34  ;;  %v3115_v32 = vstv %s2425_s17  ;;  %v511_v15 = vadd.f32 %v509_v1, %v479_v22  ;;  %v580_v52 = vmul.f32 %v579_v41, %v2361_v2  ;;  %v3118_v2 = vld [vmem:[#allocation16_spill] sm:$0xff]  ;;  %v3123_v22 = vld [vmem:[#allocation18_spill] sm:$0xff]  ;;  %s2723_s17 = sld [smem:[#allocation7 + $0x18]] }
 0x15c   : > { %988 = vrot.lane.b32.xlu1 %v2491_v63, %s3108_s13  ;;  %v2519_v57 = vpop.permute.xlu0 %656  ;;  %v431_v16 = vmul.f32 %v3115_v32, %v2224_v36  ;;  %v363_v33 = vadd.f32 %v361_v9, %v331_v50  ;;  %v3116_v31 = vmov %v3115_v32  ;;  %v512_v14 = vadd.f32 %v510_v26, %v480_v12  ;;  %v3120_v9 = vld [vmem:[#allocation17_spill] sm:$0xff] }
 0x15d   : > { %v432_v48 = vmul.f32 %v3116_v31, %v2226_v39  ;;  %v581_v36 = vmul.f32 %v579_v41, %v3117_v17  ;;  %v402_v18 = vadd.f32 %v400_v60, %v362_v5  ;;  %v3119_v62 = vstv %s2431_s15  ;;  %v3128_v17 = vld [vmem:[#allocation23_spill] sm:$0xff]  ;;  %s2732_s15 = sld [smem:[#allocation7 + $0x49]] }
 0x15e   : > { %v2526_v38 = vpop.permute.xlu1 %658  ;;  %935 = vrot.lane.b32.xlu0 %v2321_v42, %s3109_s26  ;;  %v471_v1 = vmul.f32 %v3119_v62, %v3118_v2  ;;  %v551_v49 = vadd.f32 %v549_v54, %v511_v15  ;;  %v620_v56 = vmul.f32 %v619_v27, %v2421_v59  ;;  %v403_v50 = vadd.f32 %v401_v25, %v363_v33  ;;  %v3127_v15 = vld [vmem:[#allocation22_spill] sm:$0xff] }
 0x15f   : > { %v3121_v24 = vmov %v3119_v62  ;;  %v552_v26 = vadd.f32 %v550_v47, %v512_v14  ;;  %v621_v41 = vmul.f32 %v619_v27, %v2429_v29  ;;  %v433_v60 = vadd.f32 %v431_v16, %v402_v18  ;;  %v3125_v27 = vld [vmem:[#allocation19_spill] sm:$0xff] }
 0x160   : > { %937 = vrot.lane.b32.xlu1 %v2323_v46, %s3109_s26  ;;  %v2543_v6 = vpop.permute.xlu0 %660  ;;  %v472_v39 = vmul.f32 %v3121_v24, %v3120_v9  ;;  %v3124_v54 = vstv %s2437_s20  ;;  %v582_v12 = vadd.f32 %v580_v52, %v551_v49  ;;  %v652_v59 = vmul.f32 %v651_v23, %v2487_v4  ;;  %v3129_v49 = vld [vmem:[#allocation25_spill] sm:$0xff]  ;;  %s3133_s20 = smov 127  }
 0x161   : > { %v503_v13 = vmul.f32 %v3124_v54, %v3123_v22  ;;  %v434_v29 = vadd.f32 %v432_v48, %v403_v50  ;;  %v3126_v25 = vmov %v3124_v54  ;;  %v583_v5 = vadd.f32 %v581_v36, %v552_v26  ;;  %v3131_v50 = vld [vmem:[#allocation24_spill] sm:$0xff] }
 0x162   : > { %v2548_v55 = vpop.permute.xlu1 %662  ;;  %1022 = vrot.lane.b32.xlu0 %v2445_v45, %s3110_s0  ;;  %v504_v47 = vmul.f32 %v3126_v25, %v3125_v27  ;;  %v653_v32 = vmul.f32 %v651_v23, %v2497_v7  ;;  %v473_v4 = vadd.f32 %v471_v1, %v433_v60  ;;  %v543_v52 = vmul.f32 %v542_v61, %v3127_v15 }
 0x163   : > { %v622_v33 = vadd.f32 %v620_v56, %v582_v12  ;;  %v474_v14 = vadd.f32 %v472_v39, %v434_v29  ;;  %v544_v36 = vmul.f32 %v542_v61, %v3128_v17  ;;  %v623_v18 = vadd.f32 %v621_v41, %v583_v5 }
 0x164   : > { %1024 = vrot.lane.b32.xlu1 %v2457_v44, %s3110_s0  ;;  %v2565_v19 = vpop.permute.xlu0 %676  ;;  %v505_v23 = vadd.f32 %v503_v13, %v473_v4  ;;  %v685_v62 = vstv %s2585_s30  ;;  %v3130_v56 = vstv %s2459_s24  ;;  %v666_v26 = vmul.f32 %v665_v58, %v2519_v57  ;;  %s2710_s24 = sld [smem:[#allocation7 + $0x19]]  ;;  %s2801_s30 = sld [smem:[#allocation7 + $0x1f]] }
 0x165   : > { %v654_v2 = vadd.f32 %v652_v59, %v622_v33  ;;  %v506_v1 = vadd.f32 %v504_v47, %v474_v14  ;;  %v575_v61 = vmul.f32 %v3130_v56, %v3129_v49  ;;  %v655_v9 = vadd.f32 %v653_v32, %v623_v18 }
 0x166   : > { %v2572_v35 = vpop.permute.xlu1 %678  ;;  %1026 = vrot.lane.b32.xlu0 %v2478_v8, %s3110_s0  ;;  %v545_v39 = vadd.f32 %v543_v52, %v505_v23  ;;  %v667_v13 = vmul.f32 %v665_v58, %v2526_v38  ;;  %v3134_v29 = vstv %s2466_s1  ;;  %v705_v27 = vstv %s2617_s28  ;;  %s2693_s1 = sld [smem:[#allocation7 + $0x48]]  ;;  %s2816_s28 = sld [smem:[#allocation7 + $0x1e]] }
 0x167   : > { %v546_v54 = vadd.f32 %v544_v36, %v506_v1  ;;  %v614_v57 = vmul.f32 %v3134_v29, %v2391_v30  ;;  %v731_v47 = vstv %s2619_s29  ;;  %v3135_v5 = vmov %v3134_v29  ;;  %v1599_v29 = vld [vmem:[#allocation2] sm:$0xff]  ;;  %s2837_s29 = sld [smem:[#allocation7 + $0x20]] }
 0x168   : > { %1028 = vrot.lane.b32.xlu1 %v2491_v63, %s3110_s0  ;;  %v681_v43 = vpop.permute.xlu0 %680  ;;  %v646_v15 = vmul.f32 %v645_v51, %v2453_v40  ;;  %v668_v30 = vadd.f32 %v666_v26, %v2380_v3  ;;  %v672_v52 = vmul.f32 %v671_v28, %v2543_v6  ;;  %v647_v14 = vmul.f32 %v645_v51, %v2463_v53 }
 0x169   : > { %v692_v31 = vmul.f32 %v691_v21, %v681_v43  ;;  %v725_v43 = vstv %s2589_s6  ;;  %v577_v38 = vadd.f32 %v575_v61, %v546_v54  ;;  %v669_v17 = vadd.f32 %v667_v13, %v2386_v37  ;;  %s2807_s6 = sld [smem:[#allocation7 + $0x4e]] }
 0x16a   : > { %v683_v34 = vpop.permute.xlu1 %682  ;;  %1002 = vrot.lane.b32.xlu0 %v2445_v45, %s3122_s7  ;;  %v686_v40 = vmul.f32 %v685_v62, %v2565_v19  ;;  %v687_v37 = vmul.f32 %v685_v62, %v2572_v35  ;;  %v777_v54 = vstv %s2710_s24  ;;  %s1468_s24 = sld [smem:[#allocation7 + $0x23]] }
 0x16b   : > { %v693_v7 = vmul.f32 %v691_v21, %v683_v34  ;;  %v3132_v21 = vmov %v3130_v56  ;;  %v694_v41 = vadd.f32 %v692_v31, %v654_v2 }
 0x16c   : > { %1004 = vrot.lane.b32.xlu1 %v2457_v44, %s3122_s7  ;;  %v2627_v16 = vpop.permute.xlu0 %696  ;;  %v574_v34 = vmul.f32 %v3132_v21, %v3131_v50 }
 0x16d   : > { %v695_v12 = vadd.f32 %v693_v7, %v655_v9  ;;  %v674_v7 = vadd.f32 %v672_v52, %v2399_v0  ;;  %v706_v23 = vmul.f32 %v705_v27, %v2627_v16  ;;  %v751_v9 = vstv %s2693_s1  ;;  %s1467_s1 = sld [smem:[#allocation7 + $0x53]] }
 0x16e   : > { %v2632_v48 = vpop.permute.xlu1 %698  ;;  %1006 = vrot.lane.b32.xlu0 %v2478_v8, %s3122_s7  ;;  %v576_v58 = vadd.f32 %v574_v34, %v545_v39 }
 0x16f   : > { %v707_v49 = vmul.f32 %v705_v27, %v2632_v48 }
 0x170   : > { %1008 = vrot.lane.b32.xlu1 %v2491_v63, %s3122_s7  ;;  %v701_v24 = vpop.permute.xlu0 %700  ;;  %v616_v3 = vadd.f32 %v614_v57, %v576_v58  ;;  %v1114_v57 = vrot.slane %v1599_v29, 3 }
 0x171   : > { %v712_v22 = vmul.f32 %v711_v20, %v701_v24 }
 0x172   : > { %v703_v60 = vpop.permute.xlu1 %702  ;;  %1054 = vrot.lane.b32.xlu0 %v2445_v45, %s3133_s20  ;;  %v648_v18 = vadd.f32 %v646_v15, %v616_v3 }
 0x173   : > { %v713_v59 = vmul.f32 %v711_v20, %v703_v60  ;;  %v2667_v25 = vadd.f32 %v712_v22, %v694_v41  ;;  %v615_v20 = vmul.f32 %v3135_v5, %v2397_v10  ;;  %v673_v10 = vmul.f32 %v671_v28, %v2548_v55  ;;  %v3137_v5 = vld [vmem:[#allocation15_spill] sm:$0xff] }
 0x174   : > { %1056 = vrot.lane.b32.xlu1 %v2457_v44, %s3133_s20  ;;  %v717_v4 = vpop.permute.xlu0 %716  ;;  %v745_v28 = vstv %s2649_s25  ;;  %v688_v35 = vadd.f32 %v686_v40, %v648_v18  ;;  %vm1120_vm6 = vcmp.lt.s32.totalorder %v3137_v5, 5  ;;  %v797_v18 = vstv %s2730_s3  ;;  %s1463_s25 = sld [smem:[#allocation7 + $0x51]]  ;;  %s1473_s3 = sld [smem:[#allocation7 + $0x56]] }
 0x175   : > { %v2675_v32 = vadd.f32 %v713_v59, %v695_v12  ;;  %v726_v31 = vmul.f32 %v725_v43, %v717_v4  ;;  %v617_v53 = vadd.f32 %v615_v20, %v577_v38  ;;  %v675_v1 = vadd.f32 %v673_v10, %v2407_v11  ;;  %v1598_v12 = vld [vmem:[#allocation2 + $0x8] sm:$0xff] }
 0x176   : > { %v719_v33 = vpop.permute.xlu1 %718  ;;  %1058 = vrot.lane.b32.xlu0 %v2478_v8, %s3133_s20  ;;  %v708_v11 = vadd.f32 %v706_v23, %v688_v35  ;;  %v1115_v59 = vrot.slane %v1598_v12, 3  ;;  %v1600_v38 = vld [vmem:[#allocation2 + $0x28] sm:$0xff] }
 0x177   : > { %v727_v36 = vmul.f32 %v725_v43, %v719_v33  ;;  %v2696_v6 = vadd.f32 %v726_v31, %v668_v30  ;;  %v649_v19 = vadd.f32 %v647_v14, %v617_v53  ;;  %v1116_v58 = vrot.slane %v1600_v38, 3  ;;  %v1601_v33 = vld [vmem:[#allocation2 + $0x20] sm:$0xff]  ;;  %v1602_v14 = vld [vmem:[#allocation2 + $0x18] sm:$0xff] }
 0x178   : > { %1060 = vrot.lane.b32.xlu1 %v2491_v63, %s3133_s20  ;;  %v721_v55 = vpop.permute.xlu0 %720  ;;  %v757_v30 = vstv %s2723_s17  ;;  %v1118_v31 = vrot.slane %v1601_v33, 3  ;;  %s1472_s17 = sld [smem:[#allocation7 + $0x25]] }
 0x179   : > { %v2701_v51 = vadd.f32 %v727_v36, %v669_v17  ;;  %v732_v43 = vmul.f32 %v731_v47, %v721_v55  ;;  %v689_v0 = vadd.f32 %v687_v37, %v649_v19  ;;  %v1117_v17 = vrot.slane %v1602_v14, 3 }
 0x17a   : > { %v723_v2 = vpop.permute.xlu1 %722  ;;  %1094 = vrot.lane.b32.xlu0 %v2445_v45, %s3136_s19  ;;  %v2753_v3 = vsel %vm1120_vm6, %v1115_v59, %v1116_v58  ;;  %v758_v37 = vmul.f32 %v1599_v29, %v757_v30 }
 0x17b   : > { %v733_v56 = vmul.f32 %v731_v47, %v723_v2  ;;  %v2712_v62 = vadd.f32 %v732_v43, %v674_v7  ;;  %v709_v21 = vadd.f32 %v707_v49, %v689_v0  ;;  %v763_v7 = vstv %s2732_s15  ;;  %s1470_s15 = sld [smem:[#allocation7 + $0x24]] }
 0x17c   : > { %1096 = vrot.lane.b32.xlu1 %v2457_v44, %s3136_s19  ;;  %v737_v61 = vpop.permute.xlu0 %736  ;;  %v2765_v2 = vsel %vm1120_vm6, %v1117_v17, %v1118_v31  ;;  %v764_v0 = vmul.f32 %v1602_v14, %v763_v7 }
 0x17d   : > { %v2716_v16 = vadd.f32 %v733_v56, %v675_v1  ;;  %v746_v48 = vmul.f32 %v745_v28, %v737_v61  ;;  %v2769_v1 = vsel %vm1120_vm6, %v1118_v31, %v1116_v58  ;;  %v760_v56 = vadd.f32 %v758_v37, %v2696_v6 }
 0x17e   : > { %v739_v50 = vpop.permute.xlu1 %738  ;;  %1098 = vrot.lane.b32.xlu0 %v2478_v8, %s3136_s19  ;;  %v848_v58 = vstv %s1454_s27  ;;  %s1478_s27 = sld [smem:[#allocation7 + $0x28]] }
 0x17f   : > { %v747_v34 = vmul.f32 %v745_v28, %v739_v50  ;;  %v748_v24 = vadd.f32 %v746_v48, %v708_v11  ;;  %v759_v28 = vmul.f32 %v1598_v12, %v757_v30  ;;  %v765_v50 = vmul.f32 %v1601_v33, %v763_v7 }
 0x180   : > { %1100 = vrot.lane.b32.xlu1 %v2491_v63, %s3136_s19  ;;  %v741_v26 = vpop.permute.xlu0 %740  ;;  %v803_v48 = vstv %s2743_s5  ;;  %s1474_s5 = sld [smem:[#allocation7 + $0x26]] }
 0x181   : > { %v749_v39 = vadd.f32 %v747_v34, %v709_v21  ;;  %v752_v60 = vmul.f32 %v751_v9, %v741_v26  ;;  %v761_v61 = vadd.f32 %v759_v28, %v2701_v51 }
 0x182   : > { %v743_v41 = vpop.permute.xlu1 %742  ;;  %1074 = vrot.lane.b32.xlu0 %v2445_v45, %s3109_s26 }
 0x183   : > { %v753_v22 = vmul.f32 %v751_v9, %v743_v41  ;;  %v754_v13 = vadd.f32 %v752_v60, %v2667_v25  ;;  %v783_v25 = vstv %s2721_s8  ;;  %v817_v41 = vstv %s2759_s16  ;;  %s1465_s8 = sld [smem:[#allocation7 + $0x52]]  ;;  %s1471_s16 = sld [smem:[#allocation7 + $0x55]] }
 0x184   : > { %1076 = vrot.lane.b32.xlu1 %v2457_v44, %s3109_s26  ;;  %v769_v47 = vpop.permute.xlu0 %768 }
 0x185   : > { %v755_v27 = vadd.f32 %v753_v22, %v2675_v32  ;;  %v778_v4 = vmul.f32 %v777_v54, %v769_v47  ;;  %v2749_v32 = vsel %vm1120_vm6, %v1114_v57, %v1115_v59 }
 0x186   : > { %v771_v20 = vpop.permute.xlu1 %770  ;;  %1078 = vrot.lane.b32.xlu0 %v2478_v8, %s3109_s26 }
 0x187   : > { %v779_v15 = vmul.f32 %v777_v54, %v771_v20  ;;  %v780_v52 = vadd.f32 %v778_v4, %v748_v24  ;;  %v766_v24 = vadd.f32 %v764_v0, %v2712_v62 }
 0x188   : > { %1080 = vrot.lane.b32.xlu1 %v2491_v63, %s3109_s26  ;;  %v773_v36 = vpop.permute.xlu0 %772 }
 0x189   : > { %v781_v10 = vadd.f32 %v779_v15, %v749_v39  ;;  %v784_v53 = vmul.f32 %v783_v25, %v773_v36  ;;  %v767_v39 = vadd.f32 %v765_v50, %v2716_v16  ;;  %v823_v16 = vstv %s1453_s23  ;;  %s1475_s23 = sld [smem:[#allocation7 + $0x57]] }
 0x18a   : > { %v775_v40 = vpop.permute.xlu1 %774  ;;  %1125 = vrot.lane.b32.xlu0 %v2749_v32, %s3108_s13 }
 0x18b   : > { %v785_v55 = vmul.f32 %v783_v25, %v775_v40  ;;  %v786_v23 = vadd.f32 %v784_v53, %v754_v13  ;;  %v868_v40 = vstv %s2799_s18  ;;  %v900_v53 = vstv %s2801_s30  ;;  %s1479_s18 = sld [smem:[#allocation7 + $0x59]]  ;;  %s1484_s30 = sld [smem:[#allocation7 + $0x2b]] }
 0x18c   : > { %1127 = vrot.lane.b32.xlu1 %v2753_v3, %s3108_s13  ;;  %v789_v19 = vpop.permute.xlu0 %788 }
 0x18d   : > { %v787_v43 = vadd.f32 %v785_v55, %v755_v27  ;;  %v798_v35 = vmul.f32 %v797_v18, %v789_v19 }
 0x18e   : > { %v791_v49 = vpop.permute.xlu1 %790  ;;  %1129 = vrot.lane.b32.xlu0 %v2765_v2, %s3108_s13 }
 0x18f   : > { %v799_v11 = vmul.f32 %v797_v18, %v791_v49  ;;  %v2776_v21 = vadd.f32 %v798_v35, %v760_v56  ;;  %v874_v49 = vstv %s2807_s6  ;;  %v3139_v56 = vld [vmem:[#allocation21_spill] sm:$0xff]  ;;  %s2902_s6 = sld [smem:[#allocation7 + $0x5c]] }
 0x190   : > { %1131 = vrot.lane.b32.xlu1 %v2769_v1, %s3108_s13  ;;  %v793_v6 = vpop.permute.xlu0 %792  ;;  %s1455_s13 = sld [smem:[#allocation7 + $0x4d]]  ;;  %v902_v35 = vmul.f32 %v900_v53, %v3139_v56 }
 0x191   : > { %v2780_v34 = vadd.f32 %v799_v11, %v761_v61  ;;  %v804_v51 = vmul.f32 %v803_v48, %v793_v6 }
 0x192   : > { %v795_v9 = vpop.permute.xlu1 %794  ;;  %1145 = vrot.lane.b32.xlu0 %v2749_v32, %s3122_s7 }
 0x193   : > { %v805_v26 = vmul.f32 %v803_v48, %v795_v9  ;;  %v2787_v60 = vadd.f32 %v804_v51, %v766_v24 }
 0x194   : > { %1147 = vrot.lane.b32.xlu1 %v2753_v3, %s3122_s7  ;;  %v809_v54 = vpop.permute.xlu0 %808 }
 0x195   : > { %v2791_v22 = vadd.f32 %v805_v26, %v767_v39  ;;  %v818_v12 = vmul.f32 %v817_v41, %v809_v54  ;;  %v888_v39 = vstv %s2816_s28  ;;  %s1476_s28 = sld [smem:[#allocation7 + $0x27]] }
 0x196   : > { %v811_v13 = vpop.permute.xlu1 %810  ;;  %1149 = vrot.lane.b32.xlu0 %v2765_v2, %s3122_s7 }
 0x197   : > { %v819_v62 = vmul.f32 %v817_v41, %v811_v13  ;;  %v820_v59 = vadd.f32 %v818_v12, %v780_v52  ;;  %v854_v52 = vstv %s1455_s13  ;;  %s1488_s13 = sld [smem:[#allocation7 + $0x2d]] }
 0x198   : > { %1151 = vrot.lane.b32.xlu1 %v2769_v1, %s3122_s7  ;;  %v813_v57 = vpop.permute.xlu0 %812  ;;  %s2809_s7 = sld [smem:[#allocation7 + $0x50]] }
 0x199   : > { %v821_v29 = vadd.f32 %v819_v62, %v781_v10  ;;  %v824_v47 = vmul.f32 %v823_v16, %v813_v57 }
 0x19a   : > { %v815_v27 = vpop.permute.xlu1 %814  ;;  %1165 = vrot.lane.b32.xlu0 %v2749_v32, %s3110_s0 }
 0x19b   : > { %v825_v38 = vmul.f32 %v823_v16, %v815_v27  ;;  %v826_v5 = vadd.f32 %v824_v47, %v786_v23  ;;  %v3138_v23 = vld [vmem:[#allocation20_spill] sm:$0xff]  ;;  %v920_v47 = vstv %s2837_s29  ;;  %s1480_s29 = sld [smem:[#allocation7 + $0x29]] }
 0x19c   : > { %1167 = vrot.lane.b32.xlu1 %v2753_v3, %s3110_s0  ;;  %v840_v4 = vpop.permute.xlu0 %839 }
 0x19d   : > { %v827_v20 = vadd.f32 %v825_v38, %v787_v43  ;;  %v849_v25 = vmul.f32 %v848_v58, %v840_v4  ;;  %v901_v43 = vmul.f32 %v900_v53, %v3138_v23 }
 0x19e   : > { %v842_v15 = vpop.permute.xlu1 %841  ;;  %1169 = vrot.lane.b32.xlu0 %v2765_v2, %s3110_s0  ;;  %v906_v0 = vstv %s2809_s7  ;;  %s2904_s7 = sld [smem:[#allocation7 + $0x5e]] }
 0x19f   : > { %v850_v30 = vmul.f32 %v848_v58, %v842_v15  ;;  %v851_v33 = vadd.f32 %v849_v25, %v820_v59  ;;  %v907_v24 = vmul.f32 %v906_v0, %v2321_v42  ;;  %v908_v26 = vmul.f32 %v906_v0, %v2323_v46 }
 0x1a0   : > { %1171 = vrot.lane.b32.xlu1 %v2769_v1, %s3110_s0  ;;  %v844_v14 = vpop.permute.xlu0 %843  ;;  %s2825_s0 = sld [smem:[#allocation7 + $0x4f]]  ;;  %v926_v25 = vstv %s1463_s25  ;;  %s2930_s25 = sld [smem:[#allocation7 + $0x5a]] }
 0x1a1   : > { %v852_v31 = vadd.f32 %v850_v30, %v821_v29  ;;  %v855_v10 = vmul.f32 %v854_v52, %v844_v14 }
 0x1a2   : > { %v846_v17 = vpop.permute.xlu1 %845  ;;  %1197 = vrot.lane.b32.xlu0 %v2749_v32, %s3133_s20 }
 0x1a3   : > { %v856_v36 = vmul.f32 %v854_v52, %v846_v17  ;;  %v857_v37 = vadd.f32 %v855_v10, %v826_v5 }
 0x1a4   : > { %1199 = vrot.lane.b32.xlu1 %v2753_v3, %s3133_s20  ;;  %v860_v28 = vpop.permute.xlu0 %859 }
 0x1a5   : > { %v858_v55 = vadd.f32 %v856_v36, %v827_v20  ;;  %v869_v7 = vmul.f32 %v868_v40, %v860_v28 }
 0x1a6   : > { %v862_v18 = vpop.permute.xlu1 %861  ;;  %1201 = vrot.lane.b32.xlu0 %v2765_v2, %s3133_s20  ;;  %v894_v16 = vstv %s2825_s0  ;;  %s1477_s0 = sld [smem:[#allocation7 + $0x58]] }
 0x1a7   : > { %v870_v19 = vmul.f32 %v868_v40, %v862_v18  ;;  %v871_v61 = vadd.f32 %v869_v7, %v2776_v21 }
 0x1a8   : > { %1203 = vrot.lane.b32.xlu1 %v2769_v1, %s3133_s20  ;;  %v864_v50 = vpop.permute.xlu0 %863  ;;  %s1464_s20 = sld [smem:[#allocation7 + $0x21]] }
 0x1a9   : > { %v872_v11 = vadd.f32 %v870_v19, %v2780_v34  ;;  %v875_v6 = vmul.f32 %v874_v49, %v864_v50  ;;  %v903_v9 = vadd.f32 %v901_v43, %v871_v61 }
 0x1aa   : > { %v866_v48 = vpop.permute.xlu1 %865  ;;  %1217 = vrot.lane.b32.xlu0 %v2749_v32, %s3109_s26 }
 0x1ab   : > { %v876_v51 = vmul.f32 %v874_v49, %v866_v48  ;;  %v904_v21 = vadd.f32 %v902_v35, %v872_v11  ;;  %v877_v41 = vadd.f32 %v875_v6, %v2787_v60  ;;  %v966_v35 = vstv %s1467_s1  ;;  %s2938_s1 = sld [smem:[#allocation7 + $0x2c]] }
 0x1ac   : > { %1219 = vrot.lane.b32.xlu1 %v2753_v3, %s3109_s26  ;;  %v880_v54 = vpop.permute.xlu0 %879 }
 0x1ad   : > { %v878_v34 = vadd.f32 %v876_v51, %v2791_v22  ;;  %v889_v13 = vmul.f32 %v888_v39, %v880_v54  ;;  %v2844_v12 = vadd.f32 %v907_v24, %v877_v41  ;;  %v991_v24 = vstv %s1468_s24  ;;  %s2940_s24 = sld [smem:[#allocation7 + $0x5d]] }
 0x1ae   : > { %v882_v42 = vpop.permute.xlu1 %881  ;;  %1221 = vrot.lane.b32.xlu0 %v2765_v2, %s3109_s26  ;;  %v940_v10 = vstv %s1464_s20  ;;  %s2934_s20 = sld [smem:[#allocation7 + $0x2a]] }
 0x1af   : > { %v890_v62 = vmul.f32 %v888_v39, %v882_v42  ;;  %v2849_v46 = vadd.f32 %v908_v26, %v878_v34  ;;  %v891_v60 = vadd.f32 %v889_v13, %v851_v33 }
 0x1b0   : > { %1223 = vrot.lane.b32.xlu1 %v2769_v1, %s3109_s26  ;;  %v884_v22 = vpop.permute.xlu0 %883  ;;  %s1466_s26 = sld [smem:[#allocation7 + $0x22]] }
 0x1b1   : > { %v892_v59 = vadd.f32 %v890_v62, %v852_v31  ;;  %v895_v57 = vmul.f32 %v894_v16, %v884_v22 }
 0x1b2   : > { %v886_v29 = vpop.permute.xlu1 %885  ;;  %1237 = vrot.lane.b32.xlu0 %v2749_v32, %s3136_s19 }
 0x1b3   : > { %v896_v27 = vmul.f32 %v894_v16, %v886_v29  ;;  %v897_v38 = vadd.f32 %v895_v57, %v857_v37 }
 0x1b4   : > { %1239 = vrot.lane.b32.xlu1 %v2753_v3, %s3136_s19  ;;  %v912_v5 = vpop.permute.xlu0 %911 }
 0x1b5   : > { %v898_v58 = vadd.f32 %v896_v27, %v858_v55  ;;  %v921_v4 = vmul.f32 %v920_v47, %v912_v5 }
 0x1b6   : > { %v914_v20 = vpop.permute.xlu1 %913  ;;  %1241 = vrot.lane.b32.xlu0 %v2765_v2, %s3136_s19  ;;  %v960_v18 = vstv %s1466_s26  ;;  %s2936_s26 = sld [smem:[#allocation7 + $0x5b]] }
 0x1b7   : > { %v922_v15 = vmul.f32 %v920_v47, %v914_v20  ;;  %v923_v30 = vadd.f32 %v921_v4, %v891_v60 }
 0x1b8   : > { %1243 = vrot.lane.b32.xlu1 %v2769_v1, %s3136_s19  ;;  %v916_v33 = vpop.permute.xlu0 %915  ;;  %s1469_s19 = sld [smem:[#allocation7 + $0x54]] }
 0x1b9   : > { %v924_v52 = vadd.f32 %v922_v15, %v892_v59  ;;  %v927_v14 = vmul.f32 %v926_v25, %v916_v33  ;;  %v946_v59 = vstv %s1465_s8  ;;  %s2946_s8 = sld [smem:[#allocation7 + $0x2f]] }
 0x1ba   : > { %v918_v31 = vpop.permute.xlu1 %917 }
 0x1bb   : > { %v928_v17 = vmul.f32 %v926_v25, %v918_v31  ;;  %v929_v36 = vadd.f32 %v927_v14, %v897_v38 }
 0x1bc   : > { %v932_v53 = vpop.permute.xlu0 %931 }
 0x1bd   : > { %v930_v40 = vadd.f32 %v928_v17, %v898_v58  ;;  %v941_v55 = vmul.f32 %v940_v10, %v932_v53  ;;  %v1031_v58 = vstv %s1472_s17  ;;  %v1043_v53 = vstv %s1474_s5  ;;  %s2950_s17 = sld [smem:[#allocation7 + $0x5f]]  ;;  %s2956_s5 = sld [smem:[#allocation7 + $0x61]] }
 0x1be   : > { %v934_v37 = vpop.permute.xlu1 %933  ;;  %v997_v34 = vstv %s1469_s19  ;;  %s2942_s19 = sld [smem:[#allocation7 + $0x2e]] }
 0x1bf   : > { %v942_v28 = vmul.f32 %v940_v10, %v934_v37  ;;  %v2862_v7 = vadd.f32 %v941_v55, %v903_v9 }
 0x1c0   : > { %v952_v43 = vpop.permute.xlu0 %951 }
 0x1c1   : > { %v2864_v23 = vadd.f32 %v942_v28, %v904_v21  ;;  %v961_v49 = vmul.f32 %v960_v18, %v952_v43 }
 0x1c2   : > { %v954_v19 = vpop.permute.xlu1 %953 }
 0x1c3   : > { %v962_v56 = vmul.f32 %v960_v18, %v954_v19  ;;  %v963_v0 = vadd.f32 %v961_v49, %v923_v30  ;;  %v1044_v18 = vmul.f32 %v1043_v53, %v2445_v45  ;;  %v1017_v19 = vstv %s1471_s16  ;;  %s1398_s16 = sshll.u32 %s1911_s4, 4 }
 0x1c4   : > { %v956_v11 = vpop.permute.xlu0 %955  ;;  %v1045_v49 = vmul.f32 %v1043_v53, %v2457_v44  ;;  %v1192_v53 = vstv %s2904_s7  ;;  %s1278_s7 = scalar_lea.sflag [#allocation5], %s1911_s4 }
 0x1c5   : > { %v964_v61 = vadd.f32 %v962_v56, %v924_v52  ;;  %v967_v48 = vmul.f32 %v966_v35, %v956_v11  ;;  %v1037_v52 = vstv %s1473_s3  ;;  %v1049_v56 = vstv %s1475_s23  ;;  %s2952_s3 = sld [smem:[#allocation7 + $0x60]]  ;;  %s1504_s23 = sshll.u32 %s1726_s12, 8 }
 0x1c6   : > { %v958_v50 = vpop.permute.xlu1 %957  ;;  %s1748_s12 = smov [#allocation8]  }
 0x1c7   : > { %v968_v6 = vmul.f32 %v966_v35, %v958_v50  ;;  %v969_v51 = vadd.f32 %v967_v48, %v929_v36 }
 0x1c8   : > { %v983_v9 = vpop.permute.xlu0 %982 }
 0x1c9   : > { %v970_v39 = vadd.f32 %v968_v6, %v930_v40  ;;  %v992_v21 = vmul.f32 %v991_v24, %v983_v9  ;;  %v1011_v40 = vstv %s1470_s15  ;;  %v1050_v6 = vmul.f32 %v1049_v56, %v2478_v8  ;;  %s2954_s15 = sld [smem:[#allocation7 + $0x30]] }
 0x1ca   : > { %v985_v26 = vpop.permute.xlu1 %984 }
 0x1cb   : > { %v993_v41 = vmul.f32 %v991_v24, %v985_v26  ;;  %v994_v54 = vadd.f32 %v992_v21, %v963_v0 }
 0x1cc   : > { %v987_v13 = vpop.permute.xlu0 %986 }
 0x1cd   : > { %v995_v42 = vadd.f32 %v993_v41, %v964_v61  ;;  %v998_v16 = vmul.f32 %v997_v34, %v987_v13 }
 0x1ce   : > { %v989_v62 = vpop.permute.xlu1 %988 }
 0x1cf   : > { %v999_v60 = vmul.f32 %v997_v34, %v989_v62  ;;  %v1000_v22 = vadd.f32 %v998_v16, %v969_v51 }
 0x1d0   : > { %v936_v57 = vpop.permute.xlu0 %935 }
 0x1d1   : > { %v1001_v29 = vadd.f32 %v999_v60, %v970_v39  ;;  %v947_v47 = vmul.f32 %v946_v59, %v936_v57  ;;  %v1051_v39 = vmul.f32 %v1049_v56, %v2491_v63 }
 0x1d2   : > { %v938_v27 = vpop.permute.xlu1 %937 }
 0x1d3   : > { %v948_v38 = vmul.f32 %v946_v59, %v938_v27  ;;  %v949_v5 = vadd.f32 %v947_v47, %v2844_v12  ;;  %v1186_v47 = vstv %s1488_s13 }
 0x1d4   : > { %v1023_v4 = vpop.permute.xlu0 %1022 }
 0x1d5   : > { %v950_v20 = vadd.f32 %v948_v38, %v2849_v46  ;;  %v1032_v25 = vmul.f32 %v1031_v58, %v1023_v4  ;;  %v1188_v4 = vmul.f32 %v1186_v47, %v2753_v3  ;;  %v1193_v3 = vmul.f32 %v1192_v53, %v2765_v2 }
 0x1d6   : > { %v1025_v15 = vpop.permute.xlu1 %1024 }
 0x1d7   : > { %v1033_v30 = vmul.f32 %v1031_v58, %v1025_v15  ;;  %v2868_v33 = vadd.f32 %v1032_v25, %v994_v54  ;;  %v1089_v58 = vstv %s1479_s18  ;;  %v1187_v15 = vmul.f32 %v1186_v47, %v2749_v32 }
 0x1d8   : > { %v1027_v14 = vpop.permute.xlu0 %1026 }
 0x1d9   : > { %v2870_v31 = vadd.f32 %v1033_v30, %v995_v42  ;;  %v1038_v10 = vmul.f32 %v1037_v52, %v1027_v14 }
 0x1da   : > { %v1029_v17 = vpop.permute.xlu1 %1028 }
 0x1db   : > { %v1039_v36 = vmul.f32 %v1037_v52, %v1029_v17  ;;  %v2872_v12 = vadd.f32 %v1038_v10, %v1000_v22  ;;  %v1083_v22 = vstv %s1478_s27  ;;  %v1160_v17 = vstv %s2902_s6  ;;  %s192_s27 = scalar_lea.vmem [#allocation8], %s1398_s16  ;;  %s3000_s6 = scalar_lea.hbm %s3053_s2, %s1504_s23 }
 0x1dc   : > { %v1003_v37 = vpop.permute.xlu0 %1002  ;;  %s1291_s13 = sshll.u32 %s192_s27, 4  ;;  %s3002_s13 = int_to_ptr.vmem [resolvable:$true] %s1291_s13 }
 0x1dd   : > { %v2874_v46 = vadd.f32 %v1039_v36, %v1001_v29  ;;  %v1012_v28 = vmul.f32 %v1011_v40, %v1003_v37 }
 0x1de   : > { %v1005_v55 = vpop.permute.xlu1 %1004 }
 0x1df   : > { %v1013_v43 = vmul.f32 %v1011_v40, %v1005_v55  ;;  %v1014_v35 = vadd.f32 %v1012_v28, %v2862_v7 }
 0x1e0   : > { %v1007_v61 = vpop.permute.xlu0 %1006 }
 0x1e1   : > { %v1015_v0 = vadd.f32 %v1013_v43, %v2864_v23  ;;  %v1018_v50 = vmul.f32 %v1017_v19, %v1007_v61  ;;  %v1046_v48 = vadd.f32 %v1044_v18, %v1014_v35 }
 0x1e2   : > { %v1009_v11 = vpop.permute.xlu1 %1008 }
 0x1e3   : > { %v1019_v24 = vmul.f32 %v1017_v19, %v1009_v11  ;;  %v1047_v51 = vadd.f32 %v1045_v49, %v1015_v0  ;;  %v1020_v45 = vadd.f32 %v1018_v50, %v949_v5  ;;  %v1154_v5 = vstv %s1484_s30 }
 0x1e4   : > { %v2882_v26 = vpop.permute.xlu0 %1054  ;;  %v1194_v0 = vmul.f32 %v1192_v53, %v2769_v1 }
 0x1e5   : > { %v1021_v9 = vadd.f32 %v1019_v24, %v950_v20  ;;  %v1052_v21 = vadd.f32 %v1050_v6, %v1020_v45  ;;  %v1063_v45 = vstv %s1476_s28  ;;  %s1648_s28 = scalar_lea.vmem %s3002_s13, 256 }
 0x1e6   : > { %v2884_v44 = vpop.permute.xlu1 %1056  ;;  %p1649_p12 = scmp.ne.s32.totalorder %s3002_s13, %s1648_s28 }
 0x1e7   : > { %v1053_v7 = vadd.f32 %v1051_v39, %v1021_v9  ;;  %v1069_v9 = vstv %s1477_s0  ;;  %s1652_s0 = sshll.u32 %s1748_s12, 4  ;;  %s1653_s0 = int_to_ptr.vmem [resolvable:$false] %s1652_s0 }
 0x1e8   : > { %v2886_v41 = vpop.permute.xlu0 %1058  ;;  %p1650_p13 = pnand %p1649_p12, %p3140_p2  ;;  %p1655_p0 = scmp.lt.s32.totalorder %s3002_s13, %s1653_s0 }
 0x1ea   : > { %v2888_v23 = vpop.permute.xlu1 %1060  ;;  %p1651_p6 = pneg %p1650_p13 }
 0x1eb   : > { %v1071_v47 = vmul.f32 %v1069_v9, %v2888_v23  ;;  %v1232_v23 = vstv %s2952_s3 }
 0x1ec   : > { %v2890_v34 = vpop.permute.xlu0 %1094 }
 0x1ee   : > { %v2892_v54 = vpop.permute.xlu1 %1096 }
 0x1f0   : > { %v2894_v8 = vpop.permute.xlu0 %1098 }
 0x1f2   : > { %v2896_v42 = vpop.permute.xlu1 %1100 }
 0x1f4   : > { %v1075_v63 = vpop.permute.xlu0 %1074 }
 0x1f5   : > { %v1084_v57 = vmul.f32 %v1083_v22, %v1075_v63  ;;  %v1109_v63 = vstv %s2930_s25 }
 0x1f6   : > { %v1077_v13 = vpop.permute.xlu1 %1076 }
 0x1f7   : > { %v1085_v38 = vmul.f32 %v1083_v22, %v1077_v13  ;;  %v1086_v25 = vadd.f32 %v1084_v57, %v1046_v48  ;;  %v1134_v22 = vstv %s2934_s20  ;;  %v1140_v57 = vstv %s2936_s26 }
 0x1f8   : > { %v1079_v62 = vpop.permute.xlu0 %1078 }
 0x1f9   : > { %v1090_v30 = vmul.f32 %v1089_v58, %v1079_v62  ;;  %v1087_v10 = vadd.f32 %v1085_v38, %v1047_v51  ;;  %v1065_v62 = vmul.f32 %v1063_v45, %v2884_v44  ;;  %v1070_v38 = vmul.f32 %v1069_v9, %v2886_v41 }
 0x1fa   : > { %v1081_v16 = vpop.permute.xlu1 %1080  ;;  %v1111_v44 = vmul.f32 %v1109_v63, %v2896_v42  ;;  %v1246_v42 = vstv %s2954_s15 }
 0x1fb   : > { %v1091_v36 = vmul.f32 %v1089_v58, %v1081_v16  ;;  %v1092_v18 = vadd.f32 %v1090_v30, %v1052_v21  ;;  %v1064_v16 = vmul.f32 %v1063_v45, %v2882_v26  ;;  %v1174_v58 = vstv %s2938_s1 }
 0x1fc   : > { %v2898_v60 = vpop.permute.xlu0 %1125  ;;  %v1110_v26 = vmul.f32 %v1109_v63, %v2894_v8  ;;  %v1067_v41 = vadd.f32 %v1065_v62, %v2870_v31 }
 0x1fd   : > { %v1093_v32 = vadd.f32 %v1091_v36, %v1053_v7  ;;  %v1103_v7 = vstv %s1480_s29  ;;  %v1072_v36 = vadd.f32 %v1070_v38, %v2872_v12  ;;  %s1654_s29 = scalar_lea.vmem %s1653_s0, 512 }
 0x1fe   : > { %v2900_v59 = vpop.permute.xlu1 %1127  ;;  %p1656_p1 = scmp.lt.s32.totalorder %s1654_s29, %s1648_s28 }
 0x200   : > { %v2906_v29 = vpop.permute.xlu0 %1129  ;;  %p1657_p9 = por %p1656_p1, %p1655_p0 }
 0x201   : > { %v1141_v31 = vmul.f32 %v1140_v57, %v2906_v29 }
 0x202   : > { %v2908_v27 = vpop.permute.xlu1 %1131  ;;  %p1658_p8 = pnand %p1657_p9, %p1651_p6 }
 0x204   : > { %v1146_v20 = vpop.permute.xlu0 %1145 }
 0x205   : > { %v1155_v14 = vmul.f32 %v1154_v5, %v1146_v20  ;;  %v1105_v20 = vmul.f32 %v1103_v7, %v2892_v54  ;;  %v1136_v54 = vmul.f32 %v1134_v22, %v2900_v59 }
 0x206   : > { %v1148_v52 = vpop.permute.xlu1 %1147 }
 0x207   : > { %v1156_v40 = vmul.f32 %v1154_v5, %v1148_v52  ;;  %v1157_v37 = vadd.f32 %v1155_v14, %v1086_v25  ;;  %v1180_v5 = vstv %s2940_s24  ;;  %v1226_v25 = vstv %s2946_s8 }
 0x208   : > { %v1150_v28 = vpop.permute.xlu0 %1149  ;;  %v1212_v52 = vstv %s2950_s17  ;;  %v1107_v53 = vadd.f32 %v1105_v20, %v1067_v41 }
 0x209   : > { %v1158_v55 = vadd.f32 %v1156_v40, %v1087_v10  ;;  %v1161_v19 = vmul.f32 %v1160_v17, %v1150_v28  ;;  %v2914_v49 = vadd.f32 %v1187_v15, %v1157_v37  ;;  %v1206_v15 = vstv %s2942_s19 }
 0x20a   : > { %v1152_v43 = vpop.permute.xlu1 %1151  ;;  %v1073_v10 = vadd.f32 %v1071_v47, %v2874_v46  ;;  %v1252_v28 = vstv %s2956_s5  ;;  %v1138_v59 = vadd.f32 %v1136_v54, %v1107_v53 }
 0x20b   : > { %v1162_v56 = vmul.f32 %v1160_v17, %v1152_v43  ;;  %v2917_v35 = vadd.f32 %v1188_v4, %v1158_v55  ;;  %v1163_v61 = vadd.f32 %v1161_v19, %v1092_v18  ;;  %v1104_v4 = vmul.f32 %v1103_v7, %v2890_v34 }
 0x20c   : > { %v2920_v50 = vpop.permute.xlu0 %1165  ;;  %v1066_v17 = vadd.f32 %v1064_v16, %v2868_v33  ;;  %v1135_v34 = vmul.f32 %v1134_v22, %v2898_v60  ;;  %v1113_v18 = vadd.f32 %v1111_v44, %v1073_v10  ;;  %v1112_v43 = vadd.f32 %v1110_v26, %v1072_v36 }
 0x20d   : > { %v1164_v11 = vadd.f32 %v1162_v56, %v1093_v32  ;;  %v2924_v6 = vadd.f32 %v1193_v3, %v1163_v61  ;;  %v1142_v60 = vmul.f32 %v1140_v57, %v2908_v27  ;;  %v1175_v12 = vmul.f32 %v1174_v58, %v2920_v50 }
 0x20e   : > { %v2922_v48 = vpop.permute.xlu1 %1167  ;;  %v1106_v8 = vadd.f32 %v1104_v4, %v1066_v17  ;;  %v1143_v7 = vadd.f32 %v1141_v31, %v1112_v43 }
 0x20f   : > { %v2926_v24 = vadd.f32 %v1194_v0, %v1164_v11  ;;  %v1176_v61 = vmul.f32 %v1174_v58, %v2922_v48 }
 0x210   : > { %v2928_v51 = vpop.permute.xlu0 %1169  ;;  %v1137_v3 = vadd.f32 %v1135_v34, %v1106_v8 }
 0x211   : > { %v1181_v32 = vmul.f32 %v1180_v5, %v2928_v51  ;;  %v1144_v51 = vadd.f32 %v1142_v60, %v1113_v18 }
 0x212   : > { %v2932_v2 = vpop.permute.xlu1 %1171  ;;  %v1177_v22 = vadd.f32 %v1175_v12, %v1137_v3 }
 0x213   : > { %v1182_v11 = vmul.f32 %v1180_v5, %v2932_v2  ;;  %v1183_v48 = vadd.f32 %v1181_v32, %v1143_v7  ;;  %v1178_v2 = vadd.f32 %v1176_v61, %v1138_v59 }
 0x214   : > { %v2944_v1 = vpop.permute.xlu0 %1197 }
 0x215   : > { %v1207_v27 = vmul.f32 %v1206_v15, %v2944_v1  ;;  %v1184_v47 = vadd.f32 %v1182_v11, %v1144_v51 }
 0x216   : > { %v2948_v39 = vpop.permute.xlu1 %1199 }
 0x218   : > { %v1202_v21 = vpop.permute.xlu0 %1201 }
 0x219   : > { %v1213_v63 = vmul.f32 %v1212_v52, %v1202_v21 }
 0x21a   : > { %v1204_v13 = vpop.permute.xlu1 %1203 }
 0x21b   : > { %v1214_v16 = vmul.f32 %v1212_v52, %v1204_v13  ;;  %v1215_v58 = vadd.f32 %v1213_v63, %v1183_v48 }
 0x21c   : > { %v1218_v30 = vpop.permute.xlu0 %1217 }
 0x21d   : > { %v1227_v40 = vmul.f32 %v1226_v25, %v1218_v30  ;;  %v1216_v21 = vadd.f32 %v1214_v16, %v1184_v47 }
 0x21e   : > { %v1220_v14 = vpop.permute.xlu1 %1219 }
 0x21f   : > { %v1228_v37 = vmul.f32 %v1226_v25, %v1220_v14  ;;  %v1229_v56 = vadd.f32 %v1227_v40, %v2914_v49  ;;  %v1208_v49 = vmul.f32 %v1206_v15, %v2948_v39 }
 0x220   : > { %v1222_v55 = vpop.permute.xlu0 %1221 }
 0x221   : > { %v1233_v19 = vmul.f32 %v1232_v23, %v1222_v55  ;;  %v1230_v29 = vadd.f32 %v1228_v37, %v2917_v35  ;;  %v1210_v1 = vadd.f32 %v1208_v49, %v1178_v2 }
 0x222   : > { %v1224_v33 = vpop.permute.xlu1 %1223 }
 0x223   : > { %v1234_v46 = vmul.f32 %v1232_v23, %v1224_v33  ;;  %v1235_v0 = vadd.f32 %v1233_v19, %v2924_v6 }
 0x224   : > { %v1238_v9 = vpop.permute.xlu0 %1237 }
 0x225   : > { %v1236_v45 = vadd.f32 %v1234_v46, %v2926_v24  ;;  %v1259_v50 = vadd.f32 %v1235_v0, %v1229_v56  ;;  %v1247_v57 = vmul.f32 %v1246_v42, %v1238_v9  ;;  %v1209_v24 = vadd.f32 %v1207_v27, %v1177_v22 }
 0x226   : > { %v1240_v62 = vpop.permute.xlu1 %1239 }
 0x227   : > { %v1260_v6 = vadd.f32 %v1236_v45, %v1230_v29  ;;  %v1248_v35 = vmul.f32 %v1246_v42, %v1240_v62  ;;  %v1249_v25 = vadd.f32 %v1247_v57, %v1209_v24 }
 0x228   : > { %v1242_v38 = vpop.permute.xlu0 %1241 }
 0x229   : > { %v1253_v20 = vmul.f32 %v1252_v28, %v1242_v38  ;;  %v1250_v39 = vadd.f32 %v1248_v35, %v1210_v1 }
 0x22a   : > { %v1244_v5 = vpop.permute.xlu1 %1243 }
 0x22b   : > { %v1254_v4 = vmul.f32 %v1252_v28, %v1244_v5  ;;  %v1255_v30 = vadd.f32 %v1253_v20, %v1215_v58 }
 0x22d   : > { %v1256_v13 = vadd.f32 %v1254_v4, %v1216_v21  ;;  %v1257_v15 = vadd.f32 %v1255_v30, %v1249_v25 }
 0x22f   : > { %v1258_v44 = vadd.f32 %v1256_v13, %v1250_v39  ;;  %v1261_v26 = vadd.f32 %v1259_v50, %v1257_v15 }
 0x231   : > { %v1262_v52 = vadd.f32 %v1260_v6, %v1258_v44  ;;  %v1496_v14 = vmul.f32 -1.442695, %v1261_v26 }
 0x233   : > { %v1497_v23 = vmul.f32 -1.442695, %v1262_v52  ;;  %1590 = vpow2.f32 %v1496_v14 }
 0x235   : > { %1592 = vpow2.f32 %v1497_v23 }
 0x23d   : > { %v1591_v41 = vpop.eup %1590 }
 0x23e   : > { %v1269_v54 = vadd.f32 1.0, %v1591_v41 }
 0x23f   : > { %v1593_v17 = vpop.eup %1592 }
 0x240   : > { %v1270_v34 = vadd.f32 1.0, %v1593_v17  ;;  %1594 = vrcp.f32 %v1269_v54 }
 0x242   : > { %1596 = vrcp.f32 %v1270_v34 }
 0x24a   : > { %v1595_v10 = vpop.eup %1594 }
 0x24b   : > { %1275 = vst [vmem:[%s192_s27] sm:$0xff] %v1595_v10 }
 0x24c   : > { %v1597_v36 = vpop.eup %1596 }
 0x24d   : > { %1276 = vst [vmem:[%s192_s27 + $0x8] sm:$0xff] %v1597_v36 }
 0x24e   : > { %1661 = shalt.err (!%p1658_p8)
}
 0x24f   : > { %s1662_s25 = scalar_lea.hbm %s3000_s6, 256  ;;  %s1666_s1 = scalar_lea.hbm %s3053_s2, 512 }
 0x250   : > { %p1663_p4 = scmp.ne.s32.totalorder %s3000_s6, %s1662_s25  ;;  %p1667_p5 = scmp.lt.u32.totalorder %s3000_s6, %s3053_s2 }
 0x251   : > { %p1668_p3 = scmp.lt.u32.totalorder %s1666_s1, %s1662_s25  ;;  %p1670_p12 = scmp.lt.u32.totalorder %s1662_s25, %s3000_s6 }
 0x252   : > { %p1664_p10 = pnand %p1663_p4, %p3140_p2 }
 0x253   : > { %p1669_p7 = por %p1668_p3, %p1667_p5 }
 0x254   : > { %p1665_p11 = pneg %p1664_p10 }
 0x255   : > { %p1671_p13 = por %p1670_p12, %p1669_p7 }
 0x257   : > { %p1672_p6 = pnand %p1671_p13, %p1665_p11 }
 0x259   : > { %1675 = shalt.err (!%p1672_p6)
}
 0x25a   : > { %s1749_s8 = smov 128   ;;  %s1750_s17 = smov 8  }
 0x25b   : > { %1511 = dma.vmem_to_hbm [thread:$0]  (%p3140_p2), %s3002_s13, 256, %s3000_s6, %s1278_s7, %s1749_s8, %s1749_s8, %s1750_s17  }
 0x25c PF: > { %s1306_s3 = sand.u32 1, %s1714_s9   ;;  %p3141_p0 = scmp.ne.s32.totalorder %s3084_s22, 0 }
 0x25d   : > { %p3142_p1 = scmp.ge.s32.totalorder %s1734_s14, 2  ;;  %s1307_s15 = scalar_lea.sflag [#allocation5], %s1306_s3 }
 0x25f   : > { %p1522_p9 = pnand %p3142_p1, %p3141_p0 }
 0x261   : > { %1709 = dma.done.wait (!%p1522_p9), %s1307_s15, 256  }
 0x262   : > { %1711 = vsyncadd (!%p1522_p9), %s1307_s15, 4294967040  ;;  %s19_s14 = sadd.s32 1, %s1734_s14   ;;  %s3143_s5 = sld [smem:[#allocation14_spill]] }
 0x263   : > { %p16_p8 = scmp.ge.s32.totalorder %s19_s14, 4   ;;  %s3144_s12 = sld [smem:[#allocation12_spill]] }
 0x264   : > { %s3145_s13 = sld [smem:[#allocation13_spill]]  ;;  %s3146_s9 = smov %s1718_s10 }
 0x265   : > { %s3147_s10 = smov %s1722_s11  ;;  %18 = sbr.rel (!%p16_p8) target bundleno = 10 (0xa), region = 86 }
 0x268   : > { %s3148_s11 = smov %s3143_s5 }
 0x26c   :  { %1312 = vsyncpa [#allocation4], 1 }
 0x26d   :  { %1314 = vsyncpa [#allocation4 + $0x1], 1 }
 0x26e   :  { %1315 = vsyncpa [#allocation5], 1 }
 0x26f   :  { %1317 = vsyncpa [#allocation5 + $0x1], 1 }
 0x270   :  { %1318 = vsyncpa [#allocation6], 1 }
 0x271   :  { %1320 = vsyncpa [#allocation6 + $0x1], 1 }

</bundles_post_ra>
